<compile_context>
chip_gen: v7x
topology: tpu7x:2x2x1
jax: 0.10.0
libtpu: 0.0.40
codegen_flags: <defaults>
</compile_context>

<pallas_src>
import functools

import jax
import jax.numpy as jnp
from jax import lax
from jax.experimental import pallas as pl
from jax.experimental.pallas import tpu as pltpu

BAND = 31
_HIGHEST = lax.Precision.HIGHEST


def _vmem():
    return pl.BlockSpec(memory_space=pltpu.MemorySpace.VMEM)


# ---------------------------------------------------------------------------
# Single fused kernel: 3 GSD (ModelBlock) iterations, channels-on-sublane
# ---------------------------------------------------------------------------
def _mynet_kernel(x_ref, y_ref, lrt_ref, wcat_ref, bcat_ref, lcat_ref,
                  mask_ref, out_ref, patch_ref, *, width, n_blocks):
    """Fused 3-block GSD forward in channels-on-sublane layout.

    x_ref    : (31, P)    HSI, P = padded H*W on the lane axis
    y_ref    : (8, P)     rows 0:3 = Y65, rows 3:6 = YA, rows 6:8 = 0
    lrt_ref  : (8, 31)    [ (L65@R)^T ; (LA@R)^T ; 0 ]
    wcat_ref : (3, 62, 72) per-block stacked folded conv3x3*conv1x1 weights
    bcat_ref : (3, 62, 1)  per-block stacked folded biases
    lcat_ref : (31, 62)   [ L65^T | LA^T ] stacked back-projection
    mask_ref : (9, P)     precomputed edge masks (1.0 where tap exists)
    patch_ref: (72, P)    VMEM scratch for the in-kernel im2col (9 x 8 rows)
    """
    p = x_ref.shape[1]
    x = x_ref[...]                     # (31, P)
    y = y_ref[...]                     # (8, P)
    lrt = lrt_ref[...]                 # (8, 31)
    lcat = lcat_ref[...]               # (31, 62)
    mask9 = mask_ref[...]              # (9, P)

    taps = [(dy, dx) for dy in (-1, 0, 1) for dx in (-1, 0, 1)]

    for blk in range(n_blocks):        # statically unrolled
        # Spectral residual for BOTH measurements in one matmul: (8, P).
        res = jnp.dot(lrt, x, preferred_element_type=jnp.float32) - y

        # In-kernel im2col for the 3x3 conv (padding=1): 9 XLU rolls with
        # precomputed edge masks, each written to an aligned 8-row slot.
        for j, (dy, dx) in enumerate(taps):
            d = dy * width + dx
            if d == 0:
                shifted = res
            else:
                shifted = pltpu.roll(res, (-d) % p, axis=1)
                shifted = shifted * mask9[j:j + 1, :]
            patch_ref[pl.ds(j * 8, 8), :] = shifted

        patch = patch_ref[...]                                     # (72, P)

        # Folded RT = ReLU(conv1x1(conv3x3(.))) on both branches at once.
        rt = jnp.dot(wcat_ref[blk], patch,
                     preferred_element_type=jnp.float32) + bcat_ref[blk]
        rt = jnp.maximum(rt, 0.0)                                  # (62, P)

        # Stacked back-projection + gradient-step update.
        inv = jnp.dot(lcat, rt, preferred_element_type=jnp.float32)  # (31,P)
        x = x - 0.3 * inv
        if blk == n_blocks - 1:
            x = jnp.clip(x, 0.0, 1.0)

    out_ref[...] = x


# ---------------------------------------------------------------------------
# Wrapper: one-time algebraic folding + forward pass
# ---------------------------------------------------------------------------
def prepare_params(params):
    """Fold L@R, conv3x3@conv1x1 and stack the branch/block weights once."""
    sh = params["shared"]
    r, l65, la = sh["R"], sh["L65"], sh["LA"]
    lr65 = jnp.matmul(l65, r, precision=_HIGHEST)                  # (31, 3)
    lra = jnp.matmul(la, r, precision=_HIGHEST)
    lrt = jnp.concatenate(
        [lr65.T, lra.T, jnp.zeros((2, BAND), jnp.float32)], axis=0)  # (8, 31)
    lcat = jnp.concatenate([l65.T, la.T], axis=1)                    # (31, 62)

    def fold(blk):
        # conv3x3 as (27, 31) matmul with (ky, kx, cin) row order, then fold
        # the 1x1 conv (no nonlinearity in between -> exact).
        w1 = jnp.transpose(blk["w1"], (2, 3, 1, 0)).reshape(9 * 3, BAND)
        w2 = blk["w2"][:, :, 0, 0].T                               # (cin, cout)
        wf_t = jnp.matmul(w1, w2, precision=_HIGHEST).T            # (31, 27)
        bf = (jnp.matmul(blk["b1"][None, :], w2, precision=_HIGHEST)[0]
              + blk["b2"]).reshape(BAND, 1)
        # Expand 27 K-rows into 9 aligned 8-row slots matching the patch
        # scratch: slot j rows 0:3 <- Res65 taps, rows 3:6 <- ResA taps.
        slots = wf_t.reshape(BAND, 9, 3)
        z3 = jnp.zeros((BAND, 9, 3), jnp.float32)
        z2 = jnp.zeros((BAND, 9, 2), jnp.float32)
        w65 = jnp.concatenate([slots, z3, z2], axis=2).reshape(BAND, 72)
        wa = jnp.concatenate([z3, slots, z2], axis=2).reshape(BAND, 72)
        wcat = jnp.concatenate([w65, wa], axis=0)                  # (62, 72)
        bcat = jnp.concatenate([bf, bf], axis=0)                   # (62, 1)
        return wcat, bcat

    folded = [fold(params[k]) for k in ("gsd1", "gsd2", "gsd3")]
    return {"shared": {"lrt": lrt, "lcat": lcat},
            "wcat": jnp.stack([f[0] for f in folded]),             # (3, 62, 72)
            "bcat": jnp.stack([f[1] for f in folded])}             # (3, 62, 1)


def _edge_masks(height, width, p_pad):
    """(9, p_pad) f32 masks: 1.0 where the (dy, dx) neighbour exists."""
    p = height * width
    lane = jnp.arange(p_pad, dtype=jnp.int32)
    xc = lane % width
    yc = lane // width
    valid = lane < p
    rows = []
    for dy in (-1, 0, 1):
        for dx in (-1, 0, 1):
            m = valid
            if dx == 1:
                m = m & (xc < width - 1)
            elif dx == -1:
                m = m & (xc > 0)
            if dy == 1:
                m = m & (yc < height - 1)
            elif dy == -1:
                m = m & (yc > 0)
            rows.append(m)
    return jnp.stack(rows, axis=0).astype(jnp.float32)


def mynet_forward(x, y_65, y_a, kparams):
    """x: (1, 31, H, W); y_*: (1, 3, H, W).  Returns (1, 31, H, W)."""
    _, c, h, w = x.shape
    p = h * w
    p_pad = ((p + 127) // 128) * 128           # lane-dense, unmasked stores
    # NCHW (batch=1) flattens to (C, P) for free -- no transposes anywhere.
    x_cm = x[0].reshape(c, p)
    y_cm = jnp.concatenate(
        [y_65[0].reshape(3, p), y_a[0].reshape(3, p),
         jnp.zeros((2, p), jnp.float32)], axis=0)                  # (8, P)
    if p_pad != p:
        x_cm = jnp.pad(x_cm, ((0, 0), (0, p_pad - p)))
        y_cm = jnp.pad(y_cm, ((0, 0), (0, p_pad - p)))
    masks = _edge_masks(h, w, p_pad)

    sh = kparams["shared"]
    kernel = functools.partial(_mynet_kernel, width=w, n_blocks=3)
    out = pl.pallas_call(
        kernel,
        out_shape=jax.ShapeDtypeStruct((BAND, p_pad), jnp.float32),
        in_specs=[_vmem()] * 7,
        out_specs=_vmem(),
        scratch_shapes=[pltpu.VMEM((72, p_pad), jnp.float32)],
    )(x_cm, y_cm, sh["lrt"], kparams["wcat"], kparams["bcat"], sh["lcat"],
      masks)
    # TODO(synk): prox1/prox2 (`skip(...)` DIP encoder/decoder) are not
    # defined in the provided source, so they are treated as identity.
    return out[:, :p].reshape(1, c, h, w)


# ---------------------------------------------------------------------------
# Deterministic parameters (PyTorch layouts, shapes from __init__)
# ---------------------------------------------------------------------------
def init_params(key, band=BAND):
    ks = jax.random.split(key, 6)
    shared = {
        "R": jax.random.uniform(ks[0], (band, 3), jnp.float32) / band,
        "L65": jax.random.uniform(ks[1], (band, band), jnp.float32) / band,
        "LA": jax.random.uniform(ks[2], (band, band), jnp.float32) / band,
    }

    def conv_block(k):
        k1, k2, k3, k4 = jax.random.split(k, 4)
        return {
            "w1": jax.random.normal(k1, (band, 3, 3, 3), jnp.float32) * 0.05,
            "b1": jax.random.normal(k2, (band,), jnp.float32) * 0.01,
            "w2": jax.random.normal(k3, (band, band, 1, 1), jnp.float32) * 0.05,
            "b2": jax.random.normal(k4, (band,), jnp.float32) * 0.01,
        }

    return {"shared": shared, "gsd1": conv_block(ks[3]),
            "gsd2": conv_block(ks[4]), "gsd3": conv_block(ks[5])}


# ---------------------------------------------------------------------------
# Pure-JAX reference (mirrors the PyTorch module literally) for validation
# ---------------------------------------------------------------------------
def _ref_rt(r, blk):
    h = lax.conv_general_dilated(r, blk["w1"], (1, 1), "SAME",
                                 dimension_numbers=("NCHW", "OIHW", "NCHW"),
                                 precision=_HIGHEST)
    h = h + blk["b1"][None, :, None, None]
    h = lax.conv_general_dilated(h, blk["w2"], (1, 1), "SAME",
                                 dimension_numbers=("NCHW", "OIHW", "NCHW"),
                                 precision=_HIGHEST)
    h = h + blk["b2"][None, :, None, None]
    return jnp.maximum(h, 0.0)


def _ref_block(x, y65, ya, shared, blk, clamp):
    r, l65, la = shared["R"], shared["L65"], shared["LA"]

    def lop(h, m):
        return jnp.einsum("chw,cd->dhw", h[0], m, precision=_HIGHEST)[None]

    res65 = lop(lop(x, l65), r) - y65
    resa = lop(lop(x, la), r) - ya
    out = x - 0.3 * (lop(_ref_rt(resa, blk), la)
                     + lop(_ref_rt(res65, blk), l65))
    return jnp.clip(out, 0.0, 1.0) if clamp else out


def mynet_reference(x, y65, ya, params):
    sh = params["shared"]
    x = _ref_block(x, y65, ya, sh, params["gsd1"], False)   # prox1 = identity
    x = _ref_block(x, y65, ya, sh, params["gsd2"], False)   # prox2 = identity
    return _ref_block(x, y65, ya, sh, params["gsd3"], True)


# ---------------------------------------------------------------------------
if __name__ == "__main__":
    key = jax.random.PRNGKey(0)
    kp, kx, k65, ka = jax.random.split(key, 4)
    params = init_params(kp)
    kparams = prepare_params(params)

    H = W = 16
    x = jax.random.uniform(kx, (1, BAND, H, W), jnp.float32)      # HSI, NCHW
    y_65 = jax.random.uniform(k65, (1, 3, H, W), jnp.float32)
    y_a = jax.random.uniform(ka, (1, 3, H, W), jnp.float32)

    out = jax.jit(mynet_forward)(x, y_65, y_a, kparams)
    out = jax.block_until_ready(out)

    assert out.shape == (1, BAND, H, W)
    assert out.dtype == jnp.float32
    assert bool(jnp.all((out >= 0.0) & (out <= 1.0)))

    ref = mynet_reference(x, y_65, y_a, params)
    err = float(jnp.max(jnp.abs(out - ref)))
    assert err < 5e-4, f"mismatch vs pure-JAX reference: max abs err = {err}"
    print("KERNEL_OK")
</pallas_src>

<mosaic_0001>
module attributes {stable_mosaic.version = 11 : i64} {
  func.func @_mynet_kernel(%arg0: memref<31x256xf32, #tpu.memory_space<vmem>>, %arg1: memref<8x256xf32, #tpu.memory_space<vmem>>, %arg2: memref<8x31xf32, #tpu.memory_space<vmem>>, %arg3: memref<3x62x72xf32, #tpu.memory_space<vmem>>, %arg4: memref<3x62x1xf32, #tpu.memory_space<vmem>>, %arg5: memref<31x62xf32, #tpu.memory_space<vmem>>, %arg6: memref<9x256xf32, #tpu.memory_space<vmem>>, %arg7: memref<31x256xf32, #tpu.memory_space<vmem>>, %arg8: memref<72x256xf32, #tpu.memory_space<vmem>>) attributes {dimension_semantics = [], scalar_prefetch = 0 : i64, scratch_operands = 1 : i64, tpu.core_type = #tpu.core_type<tc>} {
    %c0 = arith.constant 0 : index
    %c0_0 = arith.constant 0 : index
    %0 = vector.load %arg0[%c0, %c0_0] : memref<31x256xf32, #tpu.memory_space<vmem>>, vector<31x256xf32>
    %c0_1 = arith.constant 0 : index
    %c0_2 = arith.constant 0 : index
    %1 = vector.load %arg1[%c0_1, %c0_2] : memref<8x256xf32, #tpu.memory_space<vmem>>, vector<8x256xf32>
    %c0_3 = arith.constant 0 : index
    %c0_4 = arith.constant 0 : index
    %2 = vector.load %arg2[%c0_3, %c0_4] : memref<8x31xf32, #tpu.memory_space<vmem>>, vector<8x31xf32>
    %c0_5 = arith.constant 0 : index
    %c0_6 = arith.constant 0 : index
    %3 = vector.load %arg5[%c0_5, %c0_6] : memref<31x62xf32, #tpu.memory_space<vmem>>, vector<31x62xf32>
    %c0_7 = arith.constant 0 : index
    %c0_8 = arith.constant 0 : index
    %4 = vector.load %arg6[%c0_7, %c0_8] : memref<9x256xf32, #tpu.memory_space<vmem>>, vector<9x256xf32>
    %cst = arith.constant dense<0.000000e+00> : vector<8x256xf32>
    %5 = tpu.matmul %2, %0, %cst {dimension_numbers = #tpu.dot_dimension_numbers<[1], [0], [0], [1], [0, 0, 1, 1], [], []>} : vector<8x31xf32>, vector<31x256xf32>, vector<8x256xf32> -> vector<8x256xf32>
    %6 = arith.subf %5, %1 : vector<8x256xf32>
    %c17_i32 = arith.constant 17 : i32
    %7 = tpu.dynamic_rotate %6 by %c17_i32 dim 1 : vector<8x256xf32>, i32 -> vector<8x256xf32>
    %8 = vector.extract_strided_slice %4 {offsets = [0, 0], sizes = [1, 256], strides = [1, 1]} : vector<9x256xf32> to vector<1x256xf32>
    %9 = vector.broadcast %8 : vector<1x256xf32> to vector<8x256xf32>
    %10 = arith.mulf %7, %9 : vector<8x256xf32>
    %c0_9 = arith.constant 0 : index
    %c0_10 = arith.constant 0 : index
    %11 = vector.load %arg8[%c0_9, %c0_10] : memref<72x256xf32, #tpu.memory_space<vmem>>, vector<8x256xf32>
    tpu.vector_store %arg8[%c0_9, %c0_10], %10 {strides = array<i32>} : memref<72x256xf32, #tpu.memory_space<vmem>>, vector<8x256xf32>,
    %c16_i32 = arith.constant 16 : i32
    %12 = tpu.dynamic_rotate %6 by %c16_i32 dim 1 : vector<8x256xf32>, i32 -> vector<8x256xf32>
    %13 = vector.extract_strided_slice %4 {offsets = [1, 0], sizes = [1, 256], strides = [1, 1]} : vector<9x256xf32> to vector<1x256xf32>
    %14 = vector.broadcast %13 : vector<1x256xf32> to vector<8x256xf32>
    %15 = arith.mulf %12, %14 : vector<8x256xf32>
    %c8 = arith.constant 8 : index
    %c0_11 = arith.constant 0 : index
    %16 = vector.load %arg8[%c8, %c0_11] : memref<72x256xf32, #tpu.memory_space<vmem>>, vector<8x256xf32>
    tpu.vector_store %arg8[%c8, %c0_11], %15 {strides = array<i32>} : memref<72x256xf32, #tpu.memory_space<vmem>>, vector<8x256xf32>,
    %c15_i32 = arith.constant 15 : i32
    %17 = tpu.dynamic_rotate %6 by %c15_i32 dim 1 : vector<8x256xf32>, i32 -> vector<8x256xf32>
    %18 = vector.extract_strided_slice %4 {offsets = [2, 0], sizes = [1, 256], strides = [1, 1]} : vector<9x256xf32> to vector<1x256xf32>
    %19 = vector.broadcast %18 : vector<1x256xf32> to vector<8x256xf32>
    %20 = arith.mulf %17, %19 : vector<8x256xf32>
    %c16 = arith.constant 16 : index
    %c0_12 = arith.constant 0 : index
    %21 = vector.load %arg8[%c16, %c0_12] : memref<72x256xf32, #tpu.memory_space<vmem>>, vector<8x256xf32>
    tpu.vector_store %arg8[%c16, %c0_12], %20 {strides = array<i32>} : memref<72x256xf32, #tpu.memory_space<vmem>>, vector<8x256xf32>,
    %c1_i32 = arith.constant 1 : i32
    %22 = tpu.dynamic_rotate %6 by %c1_i32 dim 1 : vector<8x256xf32>, i32 -> vector<8x256xf32>
    %23 = vector.extract_strided_slice %4 {offsets = [3, 0], sizes = [1, 256], strides = [1, 1]} : vector<9x256xf32> to vector<1x256xf32>
    %24 = vector.broadcast %23 : vector<1x256xf32> to vector<8x256xf32>
    %25 = arith.mulf %22, %24 : vector<8x256xf32>
    %c24 = arith.constant 24 : index
    %c0_13 = arith.constant 0 : index
    %26 = vector.load %arg8[%c24, %c0_13] : memref<72x256xf32, #tpu.memory_space<vmem>>, vector<8x256xf32>
    tpu.vector_store %arg8[%c24, %c0_13], %25 {strides = array<i32>} : memref<72x256xf32, #tpu.memory_space<vmem>>, vector<8x256xf32>,
    %c32 = arith.constant 32 : index
    %c0_14 = arith.constant 0 : index
    %27 = vector.load %arg8[%c32, %c0_14] : memref<72x256xf32, #tpu.memory_space<vmem>>, vector<8x256xf32>
    tpu.vector_store %arg8[%c32, %c0_14], %6 {strides = array<i32>} : memref<72x256xf32, #tpu.memory_space<vmem>>, vector<8x256xf32>,
    %c255_i32 = arith.constant 255 : i32
    %28 = tpu.dynamic_rotate %6 by %c255_i32 dim 1 : vector<8x256xf32>, i32 -> vector<8x256xf32>
    %29 = vector.extract_strided_slice %4 {offsets = [5, 0], sizes = [1, 256], strides = [1, 1]} : vector<9x256xf32> to vector<1x256xf32>
    %30 = vector.broadcast %29 : vector<1x256xf32> to vector<8x256xf32>
    %31 = arith.mulf %28, %30 : vector<8x256xf32>
    %c40 = arith.constant 40 : index
    %c0_15 = arith.constant 0 : index
    %32 = vector.load %arg8[%c40, %c0_15] : memref<72x256xf32, #tpu.memory_space<vmem>>, vector<8x256xf32>
    tpu.vector_store %arg8[%c40, %c0_15], %31 {strides = array<i32>} : memref<72x256xf32, #tpu.memory_space<vmem>>, vector<8x256xf32>,
    %c241_i32 = arith.constant 241 : i32
    %33 = tpu.dynamic_rotate %6 by %c241_i32 dim 1 : vector<8x256xf32>, i32 -> vector<8x256xf32>
    %34 = vector.extract_strided_slice %4 {offsets = [6, 0], sizes = [1, 256], strides = [1, 1]} : vector<9x256xf32> to vector<1x256xf32>
    %35 = vector.broadcast %34 : vector<1x256xf32> to vector<8x256xf32>
    %36 = arith.mulf %33, %35 : vector<8x256xf32>
    %c48 = arith.constant 48 : index
    %c0_16 = arith.constant 0 : index
    %37 = vector.load %arg8[%c48, %c0_16] : memref<72x256xf32, #tpu.memory_space<vmem>>, vector<8x256xf32>
    tpu.vector_store %arg8[%c48, %c0_16], %36 {strides = array<i32>} : memref<72x256xf32, #tpu.memory_space<vmem>>, vector<8x256xf32>,
    %c240_i32 = arith.constant 240 : i32
    %38 = tpu.dynamic_rotate %6 by %c240_i32 dim 1 : vector<8x256xf32>, i32 -> vector<8x256xf32>
    %39 = vector.extract_strided_slice %4 {offsets = [7, 0], sizes = [1, 256], strides = [1, 1]} : vector<9x256xf32> to vector<1x256xf32>
    %40 = vector.broadcast %39 : vector<1x256xf32> to vector<8x256xf32>
    %41 = arith.mulf %38, %40 : vector<8x256xf32>
    %c56 = arith.constant 56 : index
    %c0_17 = arith.constant 0 : index
    %42 = vector.load %arg8[%c56, %c0_17] : memref<72x256xf32, #tpu.memory_space<vmem>>, vector<8x256xf32>
    tpu.vector_store %arg8[%c56, %c0_17], %41 {strides = array<i32>} : memref<72x256xf32, #tpu.memory_space<vmem>>, vector<8x256xf32>,
    %c239_i32 = arith.constant 239 : i32
    %43 = tpu.dynamic_rotate %6 by %c239_i32 dim 1 : vector<8x256xf32>, i32 -> vector<8x256xf32>
    %44 = vector.extract_strided_slice %4 {offsets = [8, 0], sizes = [1, 256], strides = [1, 1]} : vector<9x256xf32> to vector<1x256xf32>
    %45 = vector.broadcast %44 : vector<1x256xf32> to vector<8x256xf32>
    %46 = arith.mulf %43, %45 : vector<8x256xf32>
    %c64 = arith.constant 64 : index
    %c0_18 = arith.constant 0 : index
    %47 = vector.load %arg8[%c64, %c0_18] : memref<72x256xf32, #tpu.memory_space<vmem>>, vector<8x256xf32>
    tpu.vector_store %arg8[%c64, %c0_18], %46 {strides = array<i32>} : memref<72x256xf32, #tpu.memory_space<vmem>>, vector<8x256xf32>,
    %c0_19 = arith.constant 0 : index
    %c0_20 = arith.constant 0 : index
    %48 = vector.load %arg8[%c0_19, %c0_20] : memref<72x256xf32, #tpu.memory_space<vmem>>, vector<72x256xf32>
    %c0_21 = arith.constant 0 : index
    %c0_22 = arith.constant 0 : index
    %c0_23 = arith.constant 0 : index
    %49 = vector.load %arg3[%c0_21, %c0_22, %c0_23] : memref<3x62x72xf32, #tpu.memory_space<vmem>>, vector<1x62x72xf32>
    %50 = vector.shape_cast %49 : vector<1x62x72xf32> to vector<62x72xf32>
    %cst_24 = arith.constant dense<0.000000e+00> : vector<62x256xf32>
    %51 = tpu.matmul %50, %48, %cst_24 {dimension_numbers = #tpu.dot_dimension_numbers<[1], [0], [0], [1], [0, 0, 1, 1], [], []>} : vector<62x72xf32>, vector<72x256xf32>, vector<62x256xf32> -> vector<62x256xf32>
    %c0_25 = arith.constant 0 : index
    %c0_26 = arith.constant 0 : index
    %c0_27 = arith.constant 0 : index
    %52 = vector.load %arg4[%c0_25, %c0_26, %c0_27] : memref<3x62x1xf32, #tpu.memory_space<vmem>>, vector<1x62x1xf32>
    %53 = vector.shape_cast %52 : vector<1x62x1xf32> to vector<62x1xf32>
    %54 = vector.broadcast %53 : vector<62x1xf32> to vector<62x256xf32>
    %55 = arith.addf %51, %54 : vector<62x256xf32>
    %cst_28 = arith.constant 0.000000e+00 : f32
    %56 = vector.broadcast %cst_28 : f32 to vector<62x256xf32>
    %57 = arith.maximumf %55, %56 : vector<62x256xf32>
    %cst_29 = arith.constant dense<0.000000e+00> : vector<31x256xf32>
    %58 = tpu.matmul %3, %57, %cst_29 {dimension_numbers = #tpu.dot_dimension_numbers<[1], [0], [0], [1], [0, 0, 1, 1], [], []>} : vector<31x62xf32>, vector<62x256xf32>, vector<31x256xf32> -> vector<31x256xf32>
    %cst_30 = arith.constant 3.000000e-01 : f32
    %59 = vector.broadcast %cst_30 : f32 to vector<31x256xf32>
    %60 = arith.mulf %59, %58 : vector<31x256xf32>
    %61 = arith.subf %0, %60 : vector<31x256xf32>
    %cst_31 = arith.constant dense<0.000000e+00> : vector<8x256xf32>
    %62 = tpu.matmul %2, %61, %cst_31 {dimension_numbers = #tpu.dot_dimension_numbers<[1], [0], [0], [1], [0, 0, 1, 1], [], []>} : vector<8x31xf32>, vector<31x256xf32>, vector<8x256xf32> -> vector<8x256xf32>
    %63 = arith.subf %62, %1 : vector<8x256xf32>
    %c17_i32_32 = arith.constant 17 : i32
    %64 = tpu.dynamic_rotate %63 by %c17_i32_32 dim 1 : vector<8x256xf32>, i32 -> vector<8x256xf32>
    %65 = vector.extract_strided_slice %4 {offsets = [0, 0], sizes = [1, 256], strides = [1, 1]} : vector<9x256xf32> to vector<1x256xf32>
    %66 = vector.broadcast %65 : vector<1x256xf32> to vector<8x256xf32>
    %67 = arith.mulf %64, %66 : vector<8x256xf32>
    %c0_33 = arith.constant 0 : index
    %c0_34 = arith.constant 0 : index
    %68 = vector.load %arg8[%c0_33, %c0_34] : memref<72x256xf32, #tpu.memory_space<vmem>>, vector<8x256xf32>
    tpu.vector_store %arg8[%c0_33, %c0_34], %67 {strides = array<i32>} : memref<72x256xf32, #tpu.memory_space<vmem>>, vector<8x256xf32>,
    %c16_i32_35 = arith.constant 16 : i32
    %69 = tpu.dynamic_rotate %63 by %c16_i32_35 dim 1 : vector<8x256xf32>, i32 -> vector<8x256xf32>
    %70 = vector.extract_strided_slice %4 {offsets = [1, 0], sizes = [1, 256], strides = [1, 1]} : vector<9x256xf32> to vector<1x256xf32>
    %71 = vector.broadcast %70 : vector<1x256xf32> to vector<8x256xf32>
    %72 = arith.mulf %69, %71 : vector<8x256xf32>
    %c8_36 = arith.constant 8 : index
    %c0_37 = arith.constant 0 : index
    %73 = vector.load %arg8[%c8_36, %c0_37] : memref<72x256xf32, #tpu.memory_space<vmem>>, vector<8x256xf32>
    tpu.vector_store %arg8[%c8_36, %c0_37], %72 {strides = array<i32>} : memref<72x256xf32, #tpu.memory_space<vmem>>, vector<8x256xf32>,
    %c15_i32_38 = arith.constant 15 : i32
    %74 = tpu.dynamic_rotate %63 by %c15_i32_38 dim 1 : vector<8x256xf32>, i32 -> vector<8x256xf32>
    %75 = vector.extract_strided_slice %4 {offsets = [2, 0], sizes = [1, 256], strides = [1, 1]} : vector<9x256xf32> to vector<1x256xf32>
    %76 = vector.broadcast %75 : vector<1x256xf32> to vector<8x256xf32>
    %77 = arith.mulf %74, %76 : vector<8x256xf32>
    %c16_39 = arith.constant 16 : index
    %c0_40 = arith.constant 0 : index
    %78 = vector.load %arg8[%c16_39, %c0_40] : memref<72x256xf32, #tpu.memory_space<vmem>>, vector<8x256xf32>
    tpu.vector_store %arg8[%c16_39, %c0_40], %77 {strides = array<i32>} : memref<72x256xf32, #tpu.memory_space<vmem>>, vector<8x256xf32>,
    %c1_i32_41 = arith.constant 1 : i32
    %79 = tpu.dynamic_rotate %63 by %c1_i32_41 dim 1 : vector<8x256xf32>, i32 -> vector<8x256xf32>
    %80 = vector.extract_strided_slice %4 {offsets = [3, 0], sizes = [1, 256], strides = [1, 1]} : vector<9x256xf32> to vector<1x256xf32>
    %81 = vector.broadcast %80 : vector<1x256xf32> to vector<8x256xf32>
    %82 = arith.mulf %79, %81 : vector<8x256xf32>
    %c24_42 = arith.constant 24 : index
    %c0_43 = arith.constant 0 : index
    %83 = vector.load %arg8[%c24_42, %c0_43] : memref<72x256xf32, #tpu.memory_space<vmem>>, vector<8x256xf32>
    tpu.vector_store %arg8[%c24_42, %c0_43], %82 {strides = array<i32>} : memref<72x256xf32, #tpu.memory_space<vmem>>, vector<8x256xf32>,
    %c32_44 = arith.constant 32 : index
    %c0_45 = arith.constant 0 : index
    %84 = vector.load %arg8[%c32_44, %c0_45] : memref<72x256xf32, #tpu.memory_space<vmem>>, vector<8x256xf32>
    tpu.vector_store %arg8[%c32_44, %c0_45], %63 {strides = array<i32>} : memref<72x256xf32, #tpu.memory_space<vmem>>, vector<8x256xf32>,
    %c255_i32_46 = arith.constant 255 : i32
    %85 = tpu.dynamic_rotate %63 by %c255_i32_46 dim 1 : vector<8x256xf32>, i32 -> vector<8x256xf32>
    %86 = vector.extract_strided_slice %4 {offsets = [5, 0], sizes = [1, 256], strides = [1, 1]} : vector<9x256xf32> to vector<1x256xf32>
    %87 = vector.broadcast %86 : vector<1x256xf32> to vector<8x256xf32>
    %88 = arith.mulf %85, %87 : vector<8x256xf32>
    %c40_47 = arith.constant 40 : index
    %c0_48 = arith.constant 0 : index
    %89 = vector.load %arg8[%c40_47, %c0_48] : memref<72x256xf32, #tpu.memory_space<vmem>>, vector<8x256xf32>
    tpu.vector_store %arg8[%c40_47, %c0_48], %88 {strides = array<i32>} : memref<72x256xf32, #tpu.memory_space<vmem>>, vector<8x256xf32>,
    %c241_i32_49 = arith.constant 241 : i32
    %90 = tpu.dynamic_rotate %63 by %c241_i32_49 dim 1 : vector<8x256xf32>, i32 -> vector<8x256xf32>
    %91 = vector.extract_strided_slice %4 {offsets = [6, 0], sizes = [1, 256], strides = [1, 1]} : vector<9x256xf32> to vector<1x256xf32>
    %92 = vector.broadcast %91 : vector<1x256xf32> to vector<8x256xf32>
    %93 = arith.mulf %90, %92 : vector<8x256xf32>
    %c48_50 = arith.constant 48 : index
    %c0_51 = arith.constant 0 : index
    %94 = vector.load %arg8[%c48_50, %c0_51] : memref<72x256xf32, #tpu.memory_space<vmem>>, vector<8x256xf32>
    tpu.vector_store %arg8[%c48_50, %c0_51], %93 {strides = array<i32>} : memref<72x256xf32, #tpu.memory_space<vmem>>, vector<8x256xf32>,
    %c240_i32_52 = arith.constant 240 : i32
    %95 = tpu.dynamic_rotate %63 by %c240_i32_52 dim 1 : vector<8x256xf32>, i32 -> vector<8x256xf32>
    %96 = vector.extract_strided_slice %4 {offsets = [7, 0], sizes = [1, 256], strides = [1, 1]} : vector<9x256xf32> to vector<1x256xf32>
    %97 = vector.broadcast %96 : vector<1x256xf32> to vector<8x256xf32>
    %98 = arith.mulf %95, %97 : vector<8x256xf32>
    %c56_53 = arith.constant 56 : index
    %c0_54 = arith.constant 0 : index
    %99 = vector.load %arg8[%c56_53, %c0_54] : memref<72x256xf32, #tpu.memory_space<vmem>>, vector<8x256xf32>
    tpu.vector_store %arg8[%c56_53, %c0_54], %98 {strides = array<i32>} : memref<72x256xf32, #tpu.memory_space<vmem>>, vector<8x256xf32>,
    %c239_i32_55 = arith.constant 239 : i32
    %100 = tpu.dynamic_rotate %63 by %c239_i32_55 dim 1 : vector<8x256xf32>, i32 -> vector<8x256xf32>
    %101 = vector.extract_strided_slice %4 {offsets = [8, 0], sizes = [1, 256], strides = [1, 1]} : vector<9x256xf32> to vector<1x256xf32>
    %102 = vector.broadcast %101 : vector<1x256xf32> to vector<8x256xf32>
    %103 = arith.mulf %100, %102 : vector<8x256xf32>
    %c64_56 = arith.constant 64 : index
    %c0_57 = arith.constant 0 : index
    %104 = vector.load %arg8[%c64_56, %c0_57] : memref<72x256xf32, #tpu.memory_space<vmem>>, vector<8x256xf32>
    tpu.vector_store %arg8[%c64_56, %c0_57], %103 {strides = array<i32>} : memref<72x256xf32, #tpu.memory_space<vmem>>, vector<8x256xf32>,
    %c0_58 = arith.constant 0 : index
    %c0_59 = arith.constant 0 : index
    %105 = vector.load %arg8[%c0_58, %c0_59] : memref<72x256xf32, #tpu.memory_space<vmem>>, vector<72x256xf32>
    %c1 = arith.constant 1 : index
    %c0_60 = arith.constant 0 : index
    %c0_61 = arith.constant 0 : index
    %106 = vector.load %arg3[%c1, %c0_60, %c0_61] : memref<3x62x72xf32, #tpu.memory_space<vmem>>, vector<1x62x72xf32>
    %107 = vector.shape_cast %106 : vector<1x62x72xf32> to vector<62x72xf32>
    %cst_62 = arith.constant dense<0.000000e+00> : vector<62x256xf32>
    %108 = tpu.matmul %107, %105, %cst_62 {dimension_numbers = #tpu.dot_dimension_numbers<[1], [0], [0], [1], [0, 0, 1, 1], [], []>} : vector<62x72xf32>, vector<72x256xf32>, vector<62x256xf32> -> vector<62x256xf32>
    %c1_63 = arith.constant 1 : index
    %c0_64 = arith.constant 0 : index
    %c0_65 = arith.constant 0 : index
    %109 = vector.load %arg4[%c1_63, %c0_64, %c0_65] : memref<3x62x1xf32, #tpu.memory_space<vmem>>, vector<1x62x1xf32>
    %110 = vector.shape_cast %109 : vector<1x62x1xf32> to vector<62x1xf32>
    %111 = vector.broadcast %110 : vector<62x1xf32> to vector<62x256xf32>
    %112 = arith.addf %108, %111 : vector<62x256xf32>
    %cst_66 = arith.constant 0.000000e+00 : f32
    %113 = vector.broadcast %cst_66 : f32 to vector<62x256xf32>
    %114 = arith.maximumf %112, %113 : vector<62x256xf32>
    %cst_67 = arith.constant dense<0.000000e+00> : vector<31x256xf32>
    %115 = tpu.matmul %3, %114, %cst_67 {dimension_numbers = #tpu.dot_dimension_numbers<[1], [0], [0], [1], [0, 0, 1, 1], [], []>} : vector<31x62xf32>, vector<62x256xf32>, vector<31x256xf32> -> vector<31x256xf32>
    %cst_68 = arith.constant 3.000000e-01 : f32
    %116 = vector.broadcast %cst_68 : f32 to vector<31x256xf32>
    %117 = arith.mulf %116, %115 : vector<31x256xf32>
    %118 = arith.subf %61, %117 : vector<31x256xf32>
    %cst_69 = arith.constant dense<0.000000e+00> : vector<8x256xf32>
    %119 = tpu.matmul %2, %118, %cst_69 {dimension_numbers = #tpu.dot_dimension_numbers<[1], [0], [0], [1], [0, 0, 1, 1], [], []>} : vector<8x31xf32>, vector<31x256xf32>, vector<8x256xf32> -> vector<8x256xf32>
    %120 = arith.subf %119, %1 : vector<8x256xf32>
    %c17_i32_70 = arith.constant 17 : i32
    %121 = tpu.dynamic_rotate %120 by %c17_i32_70 dim 1 : vector<8x256xf32>, i32 -> vector<8x256xf32>
    %122 = vector.extract_strided_slice %4 {offsets = [0, 0], sizes = [1, 256], strides = [1, 1]} : vector<9x256xf32> to vector<1x256xf32>
    %123 = vector.broadcast %122 : vector<1x256xf32> to vector<8x256xf32>
    %124 = arith.mulf %121, %123 : vector<8x256xf32>
    %c0_71 = arith.constant 0 : index
    %c0_72 = arith.constant 0 : index
    %125 = vector.load %arg8[%c0_71, %c0_72] : memref<72x256xf32, #tpu.memory_space<vmem>>, vector<8x256xf32>
    tpu.vector_store %arg8[%c0_71, %c0_72], %124 {strides = array<i32>} : memref<72x256xf32, #tpu.memory_space<vmem>>, vector<8x256xf32>,
    %c16_i32_73 = arith.constant 16 : i32
    %126 = tpu.dynamic_rotate %120 by %c16_i32_73 dim 1 : vector<8x256xf32>, i32 -> vector<8x256xf32>
    %127 = vector.extract_strided_slice %4 {offsets = [1, 0], sizes = [1, 256], strides = [1, 1]} : vector<9x256xf32> to vector<1x256xf32>
    %128 = vector.broadcast %127 : vector<1x256xf32> to vector<8x256xf32>
    %129 = arith.mulf %126, %128 : vector<8x256xf32>
    %c8_74 = arith.constant 8 : index
    %c0_75 = arith.constant 0 : index
    %130 = vector.load %arg8[%c8_74, %c0_75] : memref<72x256xf32, #tpu.memory_space<vmem>>, vector<8x256xf32>
    tpu.vector_store %arg8[%c8_74, %c0_75], %129 {strides = array<i32>} : memref<72x256xf32, #tpu.memory_space<vmem>>, vector<8x256xf32>,
    %c15_i32_76 = arith.constant 15 : i32
    %131 = tpu.dynamic_rotate %120 by %c15_i32_76 dim 1 : vector<8x256xf32>, i32 -> vector<8x256xf32>
    %132 = vector.extract_strided_slice %4 {offsets = [2, 0], sizes = [1, 256], strides = [1, 1]} : vector<9x256xf32> to vector<1x256xf32>
    %133 = vector.broadcast %132 : vector<1x256xf32> to vector<8x256xf32>
    %134 = arith.mulf %131, %133 : vector<8x256xf32>
    %c16_77 = arith.constant 16 : index
    %c0_78 = arith.constant 0 : index
    %135 = vector.load %arg8[%c16_77, %c0_78] : memref<72x256xf32, #tpu.memory_space<vmem>>, vector<8x256xf32>
    tpu.vector_store %arg8[%c16_77, %c0_78], %134 {strides = array<i32>} : memref<72x256xf32, #tpu.memory_space<vmem>>, vector<8x256xf32>,
    %c1_i32_79 = arith.constant 1 : i32
    %136 = tpu.dynamic_rotate %120 by %c1_i32_79 dim 1 : vector<8x256xf32>, i32 -> vector<8x256xf32>
    %137 = vector.extract_strided_slice %4 {offsets = [3, 0], sizes = [1, 256], strides = [1, 1]} : vector<9x256xf32> to vector<1x256xf32>
    %138 = vector.broadcast %137 : vector<1x256xf32> to vector<8x256xf32>
    %139 = arith.mulf %136, %138 : vector<8x256xf32>
    %c24_80 = arith.constant 24 : index
    %c0_81 = arith.constant 0 : index
    %140 = vector.load %arg8[%c24_80, %c0_81] : memref<72x256xf32, #tpu.memory_space<vmem>>, vector<8x256xf32>
    tpu.vector_store %arg8[%c24_80, %c0_81], %139 {strides = array<i32>} : memref<72x256xf32, #tpu.memory_space<vmem>>, vector<8x256xf32>,
    %c32_82 = arith.constant 32 : index
    %c0_83 = arith.constant 0 : index
    %141 = vector.load %arg8[%c32_82, %c0_83] : memref<72x256xf32, #tpu.memory_space<vmem>>, vector<8x256xf32>
    tpu.vector_store %arg8[%c32_82, %c0_83], %120 {strides = array<i32>} : memref<72x256xf32, #tpu.memory_space<vmem>>, vector<8x256xf32>,
    %c255_i32_84 = arith.constant 255 : i32
    %142 = tpu.dynamic_rotate %120 by %c255_i32_84 dim 1 : vector<8x256xf32>, i32 -> vector<8x256xf32>
    %143 = vector.extract_strided_slice %4 {offsets = [5, 0], sizes = [1, 256], strides = [1, 1]} : vector<9x256xf32> to vector<1x256xf32>
    %144 = vector.broadcast %143 : vector<1x256xf32> to vector<8x256xf32>
    %145 = arith.mulf %142, %144 : vector<8x256xf32>
    %c40_85 = arith.constant 40 : index
    %c0_86 = arith.constant 0 : index
    %146 = vector.load %arg8[%c40_85, %c0_86] : memref<72x256xf32, #tpu.memory_space<vmem>>, vector<8x256xf32>
    tpu.vector_store %arg8[%c40_85, %c0_86], %145 {strides = array<i32>} : memref<72x256xf32, #tpu.memory_space<vmem>>, vector<8x256xf32>,
    %c241_i32_87 = arith.constant 241 : i32
    %147 = tpu.dynamic_rotate %120 by %c241_i32_87 dim 1 : vector<8x256xf32>, i32 -> vector<8x256xf32>
    %148 = vector.extract_strided_slice %4 {offsets = [6, 0], sizes = [1, 256], strides = [1, 1]} : vector<9x256xf32> to vector<1x256xf32>
    %149 = vector.broadcast %148 : vector<1x256xf32> to vector<8x256xf32>
    %150 = arith.mulf %147, %149 : vector<8x256xf32>
    %c48_88 = arith.constant 48 : index
    %c0_89 = arith.constant 0 : index
    %151 = vector.load %arg8[%c48_88, %c0_89] : memref<72x256xf32, #tpu.memory_space<vmem>>, vector<8x256xf32>
    tpu.vector_store %arg8[%c48_88, %c0_89], %150 {strides = array<i32>} : memref<72x256xf32, #tpu.memory_space<vmem>>, vector<8x256xf32>,
    %c240_i32_90 = arith.constant 240 : i32
    %152 = tpu.dynamic_rotate %120 by %c240_i32_90 dim 1 : vector<8x256xf32>, i32 -> vector<8x256xf32>
    %153 = vector.extract_strided_slice %4 {offsets = [7, 0], sizes = [1, 256], strides = [1, 1]} : vector<9x256xf32> to vector<1x256xf32>
    %154 = vector.broadcast %153 : vector<1x256xf32> to vector<8x256xf32>
    %155 = arith.mulf %152, %154 : vector<8x256xf32>
    %c56_91 = arith.constant 56 : index
    %c0_92 = arith.constant 0 : index
    %156 = vector.load %arg8[%c56_91, %c0_92] : memref<72x256xf32, #tpu.memory_space<vmem>>, vector<8x256xf32>
    tpu.vector_store %arg8[%c56_91, %c0_92], %155 {strides = array<i32>} : memref<72x256xf32, #tpu.memory_space<vmem>>, vector<8x256xf32>,
    %c239_i32_93 = arith.constant 239 : i32
    %157 = tpu.dynamic_rotate %120 by %c239_i32_93 dim 1 : vector<8x256xf32>, i32 -> vector<8x256xf32>
    %158 = vector.extract_strided_slice %4 {offsets = [8, 0], sizes = [1, 256], strides = [1, 1]} : vector<9x256xf32> to vector<1x256xf32>
    %159 = vector.broadcast %158 : vector<1x256xf32> to vector<8x256xf32>
    %160 = arith.mulf %157, %159 : vector<8x256xf32>
    %c64_94 = arith.constant 64 : index
    %c0_95 = arith.constant 0 : index
    %161 = vector.load %arg8[%c64_94, %c0_95] : memref<72x256xf32, #tpu.memory_space<vmem>>, vector<8x256xf32>
    tpu.vector_store %arg8[%c64_94, %c0_95], %160 {strides = array<i32>} : memref<72x256xf32, #tpu.memory_space<vmem>>, vector<8x256xf32>,
    %c0_96 = arith.constant 0 : index
    %c0_97 = arith.constant 0 : index
    %162 = vector.load %arg8[%c0_96, %c0_97] : memref<72x256xf32, #tpu.memory_space<vmem>>, vector<72x256xf32>
    %c2 = arith.constant 2 : index
    %c0_98 = arith.constant 0 : index
    %c0_99 = arith.constant 0 : index
    %163 = vector.load %arg3[%c2, %c0_98, %c0_99] : memref<3x62x72xf32, #tpu.memory_space<vmem>>, vector<1x62x72xf32>
    %164 = vector.shape_cast %163 : vector<1x62x72xf32> to vector<62x72xf32>
    %cst_100 = arith.constant dense<0.000000e+00> : vector<62x256xf32>
    %165 = tpu.matmul %164, %162, %cst_100 {dimension_numbers = #tpu.dot_dimension_numbers<[1], [0], [0], [1], [0, 0, 1, 1], [], []>} : vector<62x72xf32>, vector<72x256xf32>, vector<62x256xf32> -> vector<62x256xf32>
    %c2_101 = arith.constant 2 : index
    %c0_102 = arith.constant 0 : index
    %c0_103 = arith.constant 0 : index
    %166 = vector.load %arg4[%c2_101, %c0_102, %c0_103] : memref<3x62x1xf32, #tpu.memory_space<vmem>>, vector<1x62x1xf32>
    %167 = vector.shape_cast %166 : vector<1x62x1xf32> to vector<62x1xf32>
    %168 = vector.broadcast %167 : vector<62x1xf32> to vector<62x256xf32>
    %169 = arith.addf %165, %168 : vector<62x256xf32>
    %cst_104 = arith.constant 0.000000e+00 : f32
    %170 = vector.broadcast %cst_104 : f32 to vector<62x256xf32>
    %171 = arith.maximumf %169, %170 : vector<62x256xf32>
    %cst_105 = arith.constant dense<0.000000e+00> : vector<31x256xf32>
    %172 = tpu.matmul %3, %171, %cst_105 {dimension_numbers = #tpu.dot_dimension_numbers<[1], [0], [0], [1], [0, 0, 1, 1], [], []>} : vector<31x62xf32>, vector<62x256xf32>, vector<31x256xf32> -> vector<31x256xf32>
    %cst_106 = arith.constant 3.000000e-01 : f32
    %173 = vector.broadcast %cst_106 : f32 to vector<31x256xf32>
    %174 = arith.mulf %173, %172 : vector<31x256xf32>
    %175 = arith.subf %118, %174 : vector<31x256xf32>
    %cst_107 = arith.constant 0.000000e+00 : f32
    %cst_108 = arith.constant 1.000000e+00 : f32
    %176 = vector.broadcast %cst_107 : f32 to vector<31x256xf32>
    %177 = arith.maximumf %176, %175 : vector<31x256xf32>
    %178 = vector.broadcast %cst_108 : f32 to vector<31x256xf32>
    %179 = arith.minimumf %178, %177 : vector<31x256xf32>
    %c0_109 = arith.constant 0 : index
    %c0_110 = arith.constant 0 : index
    %180 = vector.load %arg7[%c0_109, %c0_110] : memref<31x256xf32, #tpu.memory_space<vmem>>, vector<31x256xf32>
    tpu.vector_store %arg7[%c0_109, %c0_110], %179 {strides = array<i32>} : memref<31x256xf32, #tpu.memory_space<vmem>>, vector<31x256xf32>,
    return
  }
}

</mosaic_0001>

<bundles_post_ra>
// kernel: squeeze.4
= control target key start
LH: loop header
LB: loop body
LE: loop exit
PB: predicated region body
PF: predicated region fallthrough
CT: control target
= control target key end

     0   :  { %2 = vsyncpa [#allocation1], 0  ;;  %s201_s6 = smov [#allocation0]   ;;  %s255_s0 = inlined_call_operand.hbm [shape: f32[1,3,16,16], index: 0, kind: input, shape index: {}]   ;;  %s256_s1 = inlined_call_operand.vmem [shape: f32[3,256], index: 1, kind: output, shape index: {}]  }
   0x1   :  { %s7_s7 = sshll.u32 %s201_s6, 4  ;;  %s177_s10 = scalar_lea.hbm %s255_s0, 768  ;;  %s8_s7 = int_to_ptr.vmem [resolvable:$true] %s7_s7 }
   0x2   :  { %p178_p0 = scmp.ne.s32.totalorder %s255_s0, %s177_s10  ;;  %p181_p1 = scmp.lt.u32.totalorder %s177_s10, %s255_s0 }
   0x4   :  { %p183_p2 = pnand %p181_p1, %p178_p0 }
   0x6   :  { %186 = shalt.err (!%p183_p2)
}
   0x7   :  { %s187_s15 = scalar_lea.vmem %s8_s7, 768  ;;  %p192_p4 = scmp.lt.s32.totalorder %s8_s7, %s8_s7 }
   0x8   :  { %p188_p3 = scmp.ne.s32.totalorder %s8_s7, %s187_s15  ;;  %p193_p5 = scmp.lt.s32.totalorder %s187_s15, %s187_s15 }
   0xa   :  { %p194_p6 = por %p193_p5, %p192_p4 }
   0xc   :  { %p195_p7 = pnand %p194_p6, %p188_p3 }
   0xe   :  { %198 = shalt.err (!%p195_p7)
}
   0xf   :  { %10 = dma.hbm_to_vmem [thread:$0]  %s255_s0, 768, %s8_s7, [#allocation1]  }
  0x10   :  { %199 = dma.done.wait [#allocation1], 768  }
  0x11   :  { %200 = vsyncadd [#allocation1], 4294966528  ;;  %s24_s0 = smov 3  ;;  %s27_s18 = smov 12  ;;  %vm29_vm0 = vcmask 1043458   ;;  %vm15_vm1 = vcmask 1045508  }
  0x12   :  { %s32_s19 = smov 48  ;;  %s62_s20 = smov 3  ;;  %v25_v0 = vld [vmem:[#allocation0 + $0x7] ss:$16 sm:%s24_s0]   ;;  %vm17_vm2 = vcmask 130048   ;;  %vm38_vm3 = vcmask 1048448  }
  0x13   :  { %s65_s21 = smov 12  ;;  %s70_s22 = smov 48  ;;  %v28_v1 = vld [vmem:[#allocation0 + $0x57] ss:$-24 sm:%s27_s18]   ;;  %v63_v4 = vld [vmem:[#allocation0 + $0x5] ss:$16 sm:%s62_s20]  }
  0x14   :  { %s43_s23 = smov 3  ;;  %s46_s24 = smov 12  ;;  %v33_v2 = vld [vmem:[#allocation0 - $0x21] ss:$16 sm:%s32_s19]   ;;  %v30_v3 = vsel %vm29_vm0, %v28_v1, %v25_v0  ;;  %v66_v5 = vld [vmem:[#allocation0 + $0x55] ss:$-24 sm:%s65_s21]  }
  0x15   :  { %s51_s25 = smov 48  ;;  %s81_s26 = smov 3  ;;  %v71_v6 = vld [vmem:[#allocation0 - $0x23] ss:$16 sm:%s70_s22]   ;;  %v35_v7 = vsel %vm15_vm1, %v33_v2, %v30_v3  ;;  %v68_v8 = vsel %vm29_vm0, %v66_v5, %v63_v4  ;;  %v44_v9 = vld [vmem:[#allocation0 + $0x6] ss:$16 sm:%s43_s23]  }
  0x16   :  { %s84_s27 = smov 12  ;;  %v47_v10 = vld [vmem:[#allocation0 + $0x56] ss:$-24 sm:%s46_s24]   ;;  %s202_s28 = smov 112   ;;  %v73_v12 = vsel %vm15_vm1, %v71_v6, %v68_v8  ;;  %v82_v14 = vld [vmem:[#allocation0 + $0x4] ss:$16 sm:%s81_s26]  }
  0x17   :  { %v52_v11 = vld [vmem:[#allocation0 - $0x22] ss:$16 sm:%s51_s25]   ;;  %36 = vrot.lane.b32.xlu0 %v35_v7, %s202_s28  ;;  %v49_v13 = vsel %vm29_vm0, %v47_v10, %v44_v9  ;;  %v85_v15 = vld [vmem:[#allocation0 + $0x54] ss:$-24 sm:%s84_s27]   ;;  %s89_s29 = smov 48  ;;  %s203_s30 = smov 80  }
  0x18   :  { %74 = vrot.lane.b32.xlu1 %v73_v12, %s203_s30  ;;  %v54_v16 = vsel %vm15_vm1, %v52_v11, %v49_v13  ;;  %v87_v17 = vsel %vm29_vm0, %v85_v15, %v82_v14  ;;  %v90_v18 = vld [vmem:[#allocation0 - $0x24] ss:$16 sm:%s89_s29]   ;;  %s100_s2 = smov 3  ;;  %s103_s3 = smov 12  ;;  %vm57_vm4 = vcmask 917248   ;;  %vm76_vm5 = vcmask 786048  }
  0x19   :  { %v92_v19 = vsel %vm15_vm1, %v90_v18, %v87_v17  ;;  %v101_v20 = vld [vmem:[#allocation0 + $0x3] ss:$16 sm:%s100_s2]   ;;  %s108_s4 = smov 48  ;;  %s119_s5 = smov 3  ;;  %vm95_vm6 = vcmask 654848   ;;  %vm114_vm7 = vcmask 523648  }
  0x1a   :  { %v104_v21 = vld [vmem:[#allocation0 + $0x53] ss:$-24 sm:%s103_s3]   ;;  %s122_s6 = smov 12  ;;  %s204_s7 = smov 96   ;;  %v120_v24 = vld [vmem:[#allocation0 + $0x2] ss:$16 sm:%s119_s5]  }
  0x1b   :  { %v106_v22 = vsel %vm29_vm0, %v104_v21, %v101_v20  ;;  %v109_v23 = vld [vmem:[#allocation0 - $0x25] ss:$16 sm:%s108_s4]   ;;  %55 = vrot.lane.b32.xlu0 %v54_v16, %s204_s7  ;;  %v123_v25 = vld [vmem:[#allocation0 + $0x52] ss:$-24 sm:%s122_s6]   ;;  %s127_s8 = smov 48  ;;  %s205_s9 = smov 64  }
  0x1c   :  { %93 = vrot.lane.b32.xlu1 %v92_v19, %s205_s9  ;;  %v111_v26 = vsel %vm15_vm1, %v109_v23, %v106_v22  ;;  %v125_v27 = vsel %vm29_vm0, %v123_v25, %v120_v24  ;;  %v128_v28 = vld [vmem:[#allocation0 - $0x26] ss:$16 sm:%s127_s8]   ;;  %s138_s10 = smov 3  ;;  %s141_s11 = smov 12  ;;  %vm133_vm8 = vcmask 392448   ;;  %vm152_vm9 = vcmask 261248  }
  0x1d   :  { %v130_v29 = vsel %vm15_vm1, %v128_v28, %v125_v27  ;;  %v139_v30 = vld [vmem:[#allocation0 + $0x1] ss:$16 sm:%s138_s10]   ;;  %s146_s12 = smov 48  ;;  %s13_s13 = smov 48 }
  0x1e   :  { %v142_v31 = vld [vmem:[#allocation0 + $0x51] ss:$-24 sm:%s141_s11]   ;;  %v12_v34 = vld [vmem:[#allocation0] ss:$8 sm:$0xf]   ;;  %s206_s14 = smov 48  }
  0x1f   :  { %v144_v32 = vsel %vm29_vm0, %v142_v31, %v139_v30  ;;  %v147_v33 = vld [vmem:[#allocation0 - $0x27] ss:$16 sm:%s146_s12]   ;;  %112 = vrot.lane.b32.xlu0 %v111_v26, %s206_s14  ;;  %v14_v35 = vld [vmem:[#allocation0] ss:$8 sm:%s13_s13]   ;;  %s207_s15 = smov 32   ;;  %s208_s16 = smov 16  }
  0x20   :  { %131 = vrot.lane.b32.xlu1 %v130_v29, %s207_s15  ;;  %v149_v36 = vsel %vm15_vm1, %v147_v33, %v144_v32  ;;  %v16_v37 = vsel %vm15_vm1, %v14_v35, %v12_v34 }
  0x21   :  { %18 = vst.msk [vmem:[#allocation2] ss:$8 sm:$0x3] %vm17_vm2, %v16_v37   ;;  %20 = vst.msk [vmem:[#allocation2 - $0xf] ss:$8 sm:$0xc] %vm17_vm2, %v16_v37  }
  0x22   :  { %22 = vst.msk [vmem:[#allocation2 - $0x1e] ss:$8 sm:$0x30] %vm17_vm2, %v16_v37  }
  0x23   :  { %150 = vrot.lane.b32.xlu0 %v149_v36, %s208_s16 }
  0x89   :  { %v37_v38 = vpop.permute.xlu0 %36  }
  0x8a   :  { %v75_v39 = vpop.permute.xlu1 %74   ;;  %39 = vst.msk [vmem:[#allocation2] sm:$0x7] %vm38_vm3, %v37_v38   ;;  %41 = vst.msk [vmem:[#allocation2 + $0x5] sm:$0x38] %vm38_vm3, %v37_v38  }
  0x8d   :  { %v56_v40 = vpop.permute.xlu0 %55  }
  0x8e   :  { %58 = vst.msk [vmem:[#allocation2] sm:$0x7] %vm57_vm4, %v56_v40   ;;  %60 = vst.msk [vmem:[#allocation2 + $0x5] sm:$0x38] %vm57_vm4, %v56_v40   ;;  %v94_v41 = vpop.permute.xlu1 %93  }
  0x8f   :  { %77 = vst.msk [vmem:[#allocation2] sm:$0x7] %vm76_vm5, %v75_v39   ;;  %79 = vst.msk [vmem:[#allocation2 + $0x5] sm:$0x38] %vm76_vm5, %v75_v39  }
  0x90   :  { %96 = vst.msk [vmem:[#allocation2] sm:$0x7] %vm95_vm6, %v94_v41   ;;  %98 = vst.msk [vmem:[#allocation2 + $0x5] sm:$0x38] %vm95_vm6, %v94_v41  }
  0x91   :  { %v113_v42 = vpop.permute.xlu0 %112  }
  0x92   :  { %115 = vst.msk [vmem:[#allocation2] sm:$0x7] %vm114_vm7, %v113_v42   ;;  %117 = vst.msk [vmem:[#allocation2 + $0x5] sm:$0x38] %vm114_vm7, %v113_v42   ;;  %v132_v43 = vpop.permute.xlu1 %131  }
  0x93   :  { %134 = vst.msk [vmem:[#allocation2] sm:$0x7] %vm133_vm8, %v132_v43   ;;  %136 = vst.msk [vmem:[#allocation2 + $0x5] sm:$0x38] %vm133_vm8, %v132_v43  }
  0x95   :  { %v151_v44 = vpop.permute.xlu0 %150  }
  0x96   :  { %153 = vst.msk [vmem:[#allocation2] sm:$0x7] %vm152_vm9, %v151_v44   ;;  %155 = vst.msk [vmem:[#allocation2 + $0x5] sm:$0x38] %vm152_vm9, %v151_v44  }
  0x9d   :  { %v159_v45 = vld [vmem:[#allocation2] sm:$0xf]  ;;  %v163_v46 = vld [vmem:[#allocation2 + $0x8] sm:$0xf] }
  0x9e   :  { %161 = vst [vmem:[%s256_s1] sm:$0xf] %v159_v45  ;;  %168 = vst [vmem:[%s256_s1 + $0x4] sm:$0xf] %v163_v46 }
  0x9f   :  { %167 = vsyncpa [#allocation1], 1 }

// kernel: mynet_forward.1
= control target key start
LH: loop header
LB: loop body
LE: loop exit
PB: predicated region body
PF: predicated region fallthrough
CT: control target
= control target key end

     0   :  { %vm49_vm0 = vcmask 1046528   ;;  %v1901_v3 = vmov 0.0   ;;  %vm1902_vm1 = vmmov 1   ;;  %vm45_vm3 = vcmask 252928   ;;  %s1903_s22 = smov 16   ;;  %s1904_s23 = smov 17   ;;  %s2753_s0 = inlined_call_operand.vmem [shape: f32[31,256], index: 0, kind: input, shape index: {}]   ;;  %s2754_s2 = inlined_call_operand.vmem [shape: f32[8,31], index: 2, kind: input, shape index: {}]   ;;  %s2755_s1 = inlined_call_operand.vmem [shape: f32[8,256], index: 1, kind: input, shape index: {}]   ;;  %s2756_s4 = inlined_call_operand.vmem [shape: f32[3,62,1], index: 4, kind: input, shape index: {}]   ;;  %s2757_s6 = inlined_call_operand.vmem [shape: f32[9,256], index: 6, kind: input, shape index: {}]   ;;  %s2758_s3 = inlined_call_operand.vmem [shape: f32[3,62,72], index: 3, kind: input, shape index: {}]   ;;  %s2759_s5 = inlined_call_operand.vmem [shape: f32[31,62], index: 5, kind: input, shape index: {}]   ;;  %s2760_s7 = inlined_call_operand.vmem [shape: f32[31,256], index: 7, kind: output, shape index: {}]  }
   0x1   :  { %v1955_v0 = vld [vmem:[%s2753_s0 + $0x8] sm:$0xff]  ;;  %v1960_v1 = vld [vmem:[%s2753_s0 + $0x18] sm:$0xff]  ;;  %v1965_v2 = vld [vmem:[%s2753_s0] sm:$0xff]  ;;  %120 = vmatprep.mubr.f32.mxu0 %v1901_v3  ;;  %448 = vmatprep.mubr.f32.mxu1 %v1901_v3  ;;  %s1905_s24 = smov 15   ;;  %s1906_s25 = smov 1   ;;  %v1911_v21 = vmov 0   ;;  %v133_v30 = vlaneseq }
   0x2   :  { %v1753_v4 = vpack.c.bf16 %v1960_v1, %v1955_v0  ;;  %v1974_v5 = vld [vmem:[%s2753_s0 + $0x10] sm:$0xff]  ;;  %v1979_v6 = vld [vmem:[%s2753_s0 + $0x28] sm:$0xff]  ;;  %v1984_v7 = vld [vmem:[%s2753_s0 + $0x38] sm:$0x7f]  ;;  %s1907_s26 = smov 127   ;;  %s1908_s27 = smov 113   ;;  %1896 = vset.pattern.permute.xlu0 %v1911_v21  ;;  %1897 = vset.pattern.permute.xlu1 %v1911_v21 }
   0x3   :  { %v1755_v8 = vpack.c.bf16 %v1974_v5, %v1965_v2  ;;  %v1757_v9 = vpack.c.bf16 %v1984_v7, %v1979_v6  ;;  %vm1991_vm2 = vmpackc.low %vm49_vm0, %vm1902_vm1  ;;  %v1998_v11 = vld [vmem:[%s2753_s0 + $0x20] sm:$0xff]  ;;  %v2003_v12 = vld [vmem:[%s2753_s0 + $0x30] sm:$0x7f]  ;;  %s1909_s28 = smov 112   ;;  %s1910_s29 = smov 111   ;;  %v2091_v33 = vshrl.u32 %v133_v30, 7 }
   0x4   :  { %1754 = vmatprep.subr.bf16.mxu0 %v1753_v4  ;;  %v1760_v13 = vpack.c.bf16 %v2003_v12, %v1998_v11  ;;  %v2014_v14 = vld [vmem:[%s2754_s2] sm:$0xff]  ;;  %v2030_v19 = vld [vmem:[%s2755_s1 + $0x8] sm:$0xff]  ;;  %v313_v24 = vld [vmem:[%s2756_s4 + $0x10] sm:$0xff]  ;;  %v2093_v34 = vand.u32 127, %v133_v30  ;;  %vm359_vm12 = vcmask 588800   ;;  %vm526_vm13 = vcmask 1045504  }
   0x5   :  { %1756 = vmatpush1.bf16.msra.mxu0 %v1755_v8  ;;  %v2022_v15 = vld [vmem:[%s2755_s1] sm:$0xff]  ;;  %v312_v23 = vld [vmem:[%s2756_s4 + $0x8] sm:$0xff]  ;;  %v314_v25 = vld [vmem:[%s2756_s4 + $0x18] sm:$0xff]  ;;  %v159_v36 = vsub.s32 1, %v2091_v33  ;;  %v197_v40 = vsub.s32 3, %v2091_v33  ;;  %v140_v41 = vsub.s32 0, %v2091_v33 }
   0x6   :  { %1759 = vmatprep.subr.msk.bf16.mxu0 %vm1991_vm2, %v1757_v9  ;;  %v311_v22 = vld [vmem:[%s2756_s4] sm:$0xff]  ;;  %v316_v27 = vld [vmem:[%s2756_s4 + $0x28] sm:$0xff]  ;;  %v317_v28 = vld [vmem:[%s2756_s4 + $0x30] sm:$0xff]  ;;  %vm154_vm4 = vcmp.lt.s32.totalorder %v2093_v34, 16  ;;  %v178_v42 = vsub.s32 2, %v2091_v33  ;;  %v218_v46 = vsub.s32 5, %v2091_v33 }
   0x7   :  { %v315_v26 = vld [vmem:[%s2756_s4 + $0x20] sm:$0xff]  ;;  %v318_v29 = vld [vmem:[%s2756_s4 + $0x38] sm:$0x3f]  ;;  %v2104_v39 = vld [vmem:[%s2757_s6 + $0x8] sm:$0xff]  ;;  %vm173_vm5 = vcmp.lt.s32.totalorder %v2093_v34, 15  ;;  %vm192_vm6 = vcmp.lt.s32.totalorder %v2093_v34, 1 }
   0x8   :  { %v2099_v38 = vld [vmem:[%s2757_s6] sm:$0xff]  ;;  %v2115_v47 = vrot.slane %v2104_v39, %v159_v36  ;;  %v2124_v50 = vrot.slane %v2104_v39, %v197_v40  ;;  %vm135_vm7 = vcmp.lt.s32.totalorder %v2093_v34, 17  ;;  %v2131_v52 = vrot.slane %v2104_v39, %v140_v41  ;;  %vm2263_vm14 = vmpackc.low %vm526_vm13, %vm1902_vm1  ;;  %v1900_v10 = vld [vmem:[%s2755_s1 + $0x8] sm:$0xff] }
   0x9   :  { %1762 = vmatpush1.bf16.msk.msra.mxu0 %vm1991_vm2, %v1760_v13  ;;  %v2111_v43 = vrot.slane %v2099_v38, %v159_v36  ;;  %v2128_v51 = vrot.slane %v2099_v38, %v140_v41  ;;  %v2134_v53 = vrot.slane %v2104_v39, %v178_v42  ;;  %v2137_v54 = vrot.slane %v2099_v38, %v197_v40 }
   0xa   :  { %vm213_vm8 = vcmp.lt.s32.totalorder %v2093_v34, 127  ;;  %v2142_v58 = vrot.slane %v2104_v39, %v218_v46  ;;  %vm232_vm9 = vcmp.lt.s32.totalorder %v2093_v34, 113  ;;  %vm251_vm10 = vcmp.lt.s32.totalorder %v2093_v34, 112 }
   0xb   :  { %vm270_vm11 = vcmp.lt.s32.totalorder %v2093_v34, 111  ;;  %vm513_vm15 = vcmask 506880   ;;  %v1724_v34 = vld [vmem:[%s2758_s3 + $0x88] sm:$0xff] }
   0xc   :  { %1670 = vmatmul.mubr.msk.f32.vlgmr.msra.gmra.mrb[0].mxu0 %vm45_vm3, %v2014_v14 }
   0xd   :  { %597 = vmatprep.mubr.f32.mxu0 %v1901_v3 }
  0xdf   :  { %v122_v16 = vpop.f32.mrb[0].mxu0 }
  0xe0   :  { %v2025_v17 = vsub.f32 %v122_v16, %v2022_v15  ;;  %v124_v18 = vpop.f32.mrb[1].mxu0  ;;  %v2159_v16 = vrot.slane %v2099_v38, %v178_v42 }
  0xe1   :  { %v2037_v20 = vsub.f32 %v124_v18, %v2030_v19 }
  0xe2   :  { %150 = vrot.lane.b32.xlu1 %v2025_v17, %s1903_s22  ;;  %129 = vrot.lane.b32.xlu0 %v2025_v17, %s1904_s23 }
  0xe6   :  { %169 = vrot.lane.b32.xlu0 %v2025_v17, %s1905_s24  ;;  %152 = vrot.lane.b32.xlu1 %v2037_v20, %s1903_s22 }
  0xea   :  { %188 = vrot.lane.b32.xlu0 %v2025_v17, %s1906_s25  ;;  %171 = vrot.lane.b32.xlu1 %v2037_v20, %s1905_s24 }
  0xee   :  { %190 = vrot.lane.b32.xlu1 %v2037_v20, %s1906_s25  ;;  %131 = vrot.lane.b32.xlu0 %v2037_v20, %s1904_s23 }
  0xf2   :  { %211 = vrot.lane.b32.xlu1 %v2037_v20, %s1907_s26  ;;  %209 = vrot.lane.b32.xlu0 %v2025_v17, %s1907_s26 }
  0xf6   :  { %230 = vrot.lane.b32.xlu1 %v2037_v20, %s1908_s27  ;;  %228 = vrot.lane.b32.xlu0 %v2025_v17, %s1908_s27 }
  0xfa   :  { %249 = vrot.lane.b32.xlu1 %v2037_v20, %s1909_s28  ;;  %247 = vrot.lane.b32.xlu0 %v2025_v17, %s1909_s28 }
  0xfe   :  { %268 = vrot.lane.b32.xlu1 %v2037_v20, %s1910_s29  ;;  %266 = vrot.lane.b32.xlu0 %v2025_v17, %s1910_s29 }
 0x102   :  { %321 = vperm.xlu0 %1896, %v311_v22   ;;  %326 = vperm.xlu1 %1897, %v312_v23  }
 0x106   :  { %331 = vperm.xlu1 %1897, %v313_v24   ;;  %336 = vperm.xlu0 %1896, %v314_v25  }
 0x10a   :  { %341 = vperm.xlu1 %1897, %v315_v26   ;;  %346 = vperm.xlu0 %1896, %v316_v27   ;;  %v2166_v27 = vrot.slane %v2099_v38, %v218_v46 }
 0x10e   :  { %351 = vperm.xlu1 %1897, %v317_v28   ;;  %356 = vperm.xlu0 %1896, %v318_v29   ;;  %v237_v29 = vsub.s32 6, %v2091_v33 }
 0x110   :  { %v2179_v42 = vrot.slane %v2099_v38, %v237_v29 }
 0x154   :  { %v151_v31 = vpop.permute.xlu1 %150  ;;  %v130_v32 = vpop.permute.xlu0 %129 }
 0x158   :  { %v170_v35 = vpop.permute.xlu0 %169  ;;  %v153_v37 = vpop.permute.xlu1 %152 }
 0x159   :  { %v155_v48 = vsel %vm154_vm4, %v151_v31, %v153_v37  ;;  %v156_v49 = vsel %vm154_vm4, %v153_v37, %v151_v31 }
 0x15a   :  { %v165_v55 = vmul.f32 %v2111_v43, %v156_v49  ;;  %v166_v59 = vmul.f32 %v2115_v47, %v155_v48 }
 0x15c   :  { %v189_v44 = vpop.permute.xlu0 %188  ;;  %v172_v45 = vpop.permute.xlu1 %171 }
 0x15d   :  { %v174_v60 = vsel %vm173_vm5, %v170_v35, %v172_v45  ;;  %v175_v18 = vsel %vm173_vm5, %v172_v45, %v170_v35  ;;  %v256_v35 = vsub.s32 7, %v2091_v33 }
 0x15e   :  { %v185_v21 = vmul.f32 %v2134_v53, %v174_v60  ;;  %v184_v36 = vmul.f32 %v2159_v16, %v175_v18  ;;  %v2216_v18 = vld [vmem:[%s2757_s6 + $0x10] ss:$0 sm:$0xff] }
 0x15f   :  { %v2187_v33 = vrot.slane %v2099_v38, %v256_v35  ;;  %v2190_v48 = vrot.slane %v2104_v39, %v256_v35 }
 0x160   :  { %v191_v56 = vpop.permute.xlu1 %190  ;;  %v132_v57 = vpop.permute.xlu0 %131 }
 0x161   :  { %v193_v61 = vsel %vm192_vm6, %v189_v44, %v191_v56  ;;  %v136_v62 = vsel %vm135_vm7, %v130_v32, %v132_v57  ;;  %v137_v63 = vsel %vm135_vm7, %v132_v57, %v130_v32  ;;  %v194_v4 = vsel %vm192_vm6, %v191_v56, %v189_v44 }
 0x162   :  { %v204_v8 = vmul.f32 %v2124_v50, %v193_v61  ;;  %v146_v9 = vmul.f32 %v2128_v51, %v137_v63  ;;  %v147_v13 = vmul.f32 %v2131_v52, %v136_v62  ;;  %v203_v26 = vmul.f32 %v2137_v54, %v194_v4  ;;  %v2209_v63 = vld [vmem:[%s2757_s6 + $0x18] ss:$0 sm:$0xff] }
 0x163   :  { %v2182_v44 = vrot.slane %v2104_v39, %v237_v29  ;;  %v307_v29 = vld [vmem:[%s2758_s3 + $0x20] sm:$0xff] }
 0x164   :  { %v212_v22 = vpop.permute.xlu1 %211  ;;  %v210_v23 = vpop.permute.xlu0 %209  ;;  %v1763_v24 = vpack.c.bf16 %v166_v59, %v147_v13  ;;  %v1765_v25 = vpack.c.bf16 %v165_v55, %v146_v9  ;;  %v1767_v32 = vpack.c.bf16 %v204_v8, %v185_v21  ;;  %v1769_v45 = vpack.c.bf16 %v203_v26, %v184_v36  ;;  %v305_v26 = vld [vmem:[%s2758_s3 + $0x10] sm:$0xff] }
 0x165   :  { %v215_v28 = vsel %vm213_vm8, %v212_v22, %v210_v23  ;;  %v214_v30 = vsel %vm213_vm8, %v210_v23, %v212_v22 }
 0x166   :  { %v225_v31 = vmul.f32 %v2142_v58, %v215_v28  ;;  %1764 = vmatprep.subr.bf16.mxu1 %v1763_v24  ;;  %v224_v41 = vmul.f32 %v2166_v27, %v214_v30  ;;  %v303_v24 = vld [vmem:[%s2758_s3] sm:$0xff]  ;;  %v306_v28 = vld [vmem:[%s2758_s3 + $0x18] sm:$0xff]  ;;  %v308_v30 = vld [vmem:[%s2758_s3 + $0x28] sm:$0xff] }
 0x167   :  { %1766 = vmatpush1.bf16.msra.mxu1 %v1765_v25  ;;  %v304_v25 = vld [vmem:[%s2758_s3 + $0x8] sm:$0xff] }
 0x168   :  { %v231_v37 = vpop.permute.xlu1 %230  ;;  %1768 = vmatprep.subr.bf16.mxu1 %v1767_v32  ;;  %v229_v40 = vpop.permute.xlu0 %228  ;;  %v1771_v46 = vpack.c.bf16 %v225_v31, %v2037_v20  ;;  %v1773_v59 = vpack.c.bf16 %v224_v41, %v2025_v17  ;;  %v309_v31 = vld [vmem:[%s2758_s3 + $0x30] sm:$0xff]  ;;  %v310_v32 = vld [vmem:[%s2758_s3 + $0x38] sm:$0x3f] }
 0x169   :  { %v233_v49 = vsel %vm232_vm9, %v229_v40, %v231_v37  ;;  %v234_v55 = vsel %vm232_vm9, %v231_v37, %v229_v40 }
 0x16a   :  { %v243_v39 = vmul.f32 %v2179_v42, %v233_v49  ;;  %v244_v60 = vmul.f32 %v2182_v44, %v234_v55 }
 0x16b   :  { %1770 = vmatpush1.bf16.msra.mxu1 %v1769_v45 }
 0x16c   :  { %v250_v56 = vpop.permute.xlu1 %249  ;;  %1772 = vmatprep.subr.bf16.mxu1 %v1771_v46  ;;  %v248_v57 = vpop.permute.xlu0 %247 }
 0x16d   :  { %v252_v20 = vsel %vm251_vm10, %v248_v57, %v250_v56  ;;  %v253_v38 = vsel %vm251_vm10, %v250_v56, %v248_v57 }
 0x16e   :  { %v262_v61 = vmul.f32 %v2187_v33, %v252_v20  ;;  %v263_v62 = vmul.f32 %v2190_v48, %v253_v38 }
 0x16f   :  { %1774 = vmatpush1.bf16.msra.mxu1 %v1773_v59 }
 0x170   :  { %v269_v4 = vpop.permute.xlu1 %268  ;;  %v267_v8 = vpop.permute.xlu0 %266  ;;  %v1775_v9 = vpack.c.bf16 %v263_v62, %v244_v60  ;;  %v1777_v17 = vpack.c.bf16 %v262_v61, %v243_v39 }
 0x171   :  { %v272_v13 = vsel %vm270_vm11, %v269_v4, %v267_v8  ;;  %v271_v21 = vsel %vm270_vm11, %v267_v8, %v269_v4 }
 0x172   :  { %v282_v22 = vmul.f32 %v2209_v63, %v272_v13  ;;  %1776 = vmatprep.subr.bf16.mxu1 %v1775_v9  ;;  %v281_v23 = vmul.f32 %v2216_v18, %v271_v21 }
 0x173   :  { %1778 = vmatpush1.bf16.msra.mxu1 %v1777_v17 }
 0x174   :  { %400 = vmatprep.subr.mxu1 %v282_v22 }
 0x177   :  { %401 = vmatpush1.msra.mxu1 %v281_v23 }
 0x178   :  { %1673 = vmatmul.mubr.msk.f32.vlgmr.msra.gmra.mrb[0].mxu1 %vm359_vm12, %v303_v24 }
 0x179   :  { %454 = vmatprep.mubr.f32.mxu1 %v1901_v3 }
 0x17c   :  { %1674 = vmatmul.mubr.msk.f32.gmra.mrb[2].mxu1 %vm359_vm12, %v304_v25 }
 0x17d   :  { %460 = vmatprep.mubr.f32.mxu1 %v1901_v3 }
 0x180   :  { %1675 = vmatmul.mubr.msk.f32.gmra.mrb[4].mxu1 %vm359_vm12, %v305_v26 }
 0x181   :  { %466 = vmatprep.mubr.f32.mxu1 %v1901_v3  ;;  %v322_v36 = vpop.permute.xlu0 %321  ;;  %v327_v40 = vpop.permute.xlu1 %326 }
 0x184   :  { %1676 = vmatmul.mubr.msk.f32.gmra.mrb[6].mxu1 %vm359_vm12, %v306_v28 }
 0x185   :  { %472 = vmatprep.mubr.f32.mxu1 %v1901_v3  ;;  %v332_v39 = vpop.permute.xlu1 %331  ;;  %v337_v17 = vpop.permute.xlu0 %336 }
 0x188   :  { %1677 = vmatmul.mubr.msk.f32.gmra.mrb[8].mxu1 %vm359_vm12, %v307_v29 }
 0x189   :  { %478 = vmatprep.mubr.f32.mxu1 %v1901_v3 }
 0x18c   :  { %1678 = vmatmul.mubr.msk.f32.gmra.mrb[10].mxu1 %vm359_vm12, %v308_v30 }
 0x18d   :  { %484 = vmatprep.mubr.f32.mxu1 %v1901_v3 }
 0x190   :  { %1679 = vmatmul.mubr.msk.f32.gmra.mrb[12].mxu1 %vm359_vm12, %v309_v31 }
 0x191   :  { %490 = vmatprep.mubr.f32.mxu1 %v1901_v3 }
 0x194   :  { %1680 = vmatmul.mubr.msk.f32.gmra.mrb[14].mxu1 %vm359_vm12, %v310_v32  ;;  %v342_v32 = vpop.permute.xlu1 %341 }
 0x195   :  { %963 = vmatprep.mubr.f32.mxu1 %v1901_v3 }
 0x24b   :  { %v450_v35 = vpop.f32.mrb[0].mxu1 }
 0x24c   :  { %v452_v37 = vpop.f32.mrb[1].mxu1  ;;  %v451_v41 = vadd.f32 %v450_v35, %v322_v36 }
 0x24d   :  { %v453_v45 = vadd.f32 %v452_v37, %v322_v36  ;;  %v347_v37 = vpop.permute.xlu0 %346 }
 0x24e   :  { %v497_v57 = vmax.f32 %v451_v41, 0.0 }
 0x24f   :  { %v456_v46 = vpop.f32.mrb[2].mxu1  ;;  %v498_v38 = vmax.f32 %v453_v45, 0.0 }
 0x250   :  { %v457_v49 = vadd.f32 %v456_v46, %v327_v40  ;;  %v458_v55 = vpop.f32.mrb[3].mxu1 }
 0x251   :  { %v459_v56 = vadd.f32 %v458_v55, %v327_v40 }
 0x252   :  { %v499_v20 = vmax.f32 %v457_v49, 0.0 }
 0x253   :  { %v500_v59 = vmax.f32 %v459_v56, 0.0  ;;  %v462_v60 = vpop.f32.mrb[4].mxu1 }
 0x254   :  { %v1781_v61 = vpack.c.bf16 %v499_v20, %v497_v57  ;;  %v464_v62 = vpop.f32.mrb[5].mxu1  ;;  %v463_v8 = vadd.f32 %v462_v60, %v332_v39  ;;  %v352_v60 = vpop.permute.xlu1 %351 }
 0x255   :  { %v1779_v4 = vpack.c.bf16 %v500_v59, %v498_v38  ;;  %v465_v9 = vadd.f32 %v464_v62, %v332_v39 }
 0x256   :  { %v501_v24 = vmax.f32 %v463_v8, 0.0 }
 0x257   :  { %v468_v13 = vpop.f32.mrb[6].mxu1  ;;  %1780 = vmatprep.subr.bf16.mxu0 %v1779_v4  ;;  %v502_v26 = vmax.f32 %v465_v9, 0.0  ;;  %v357_v4 = vpop.permute.xlu0 %356 }
 0x258   :  { %v469_v21 = vadd.f32 %v468_v13, %v337_v17  ;;  %v470_v22 = vpop.f32.mrb[7].mxu1  ;;  %1782 = vmatpush1.bf16.msra.mxu0 %v1781_v61 }
 0x259   :  { %v471_v23 = vadd.f32 %v470_v22, %v337_v17 }
 0x25a   :  { %v503_v25 = vmax.f32 %v469_v21, 0.0 }
 0x25b   :  { %v504_v28 = vmax.f32 %v471_v23, 0.0  ;;  %v474_v29 = vpop.f32.mrb[8].mxu1 }
 0x25c   :  { %v1785_v30 = vpack.c.bf16 %v503_v25, %v501_v24  ;;  %v476_v31 = vpop.f32.mrb[9].mxu1  ;;  %v475_v36 = vadd.f32 %v474_v29, %v342_v32 }
 0x25d   :  { %v1783_v35 = vpack.c.bf16 %v504_v28, %v502_v26  ;;  %v477_v40 = vadd.f32 %v476_v31, %v342_v32  ;;  %v2282_v31 = vld [vmem:[%s2759_s5 + $0x8] sm:$0xff]  ;;  %v2290_v32 = vld [vmem:[%s2759_s5 + $0x10] sm:$0xff] }
 0x25e   :  { %v505_v55 = vmax.f32 %v475_v36, 0.0 }
 0x25f   :  { %v480_v41 = vpop.f32.mrb[10].mxu1  ;;  %1784 = vmatprep.subr.bf16.mxu0 %v1783_v35  ;;  %v506_v57 = vmax.f32 %v477_v40, 0.0  ;;  %v2298_v35 = vld [vmem:[%s2759_s5 + $0x18] sm:$0x7f] }
 0x260   :  { %v481_v45 = vadd.f32 %v480_v41, %v347_v37  ;;  %v482_v46 = vpop.f32.mrb[11].mxu1  ;;  %1786 = vmatpush1.bf16.msra.mxu0 %v1785_v30  ;;  %v2274_v30 = vld [vmem:[%s2759_s5] sm:$0xff] }
 0x261   :  { %v483_v49 = vadd.f32 %v482_v46, %v347_v37 }
 0x262   :  { %v507_v56 = vmax.f32 %v481_v45, 0.0 }
 0x263   :  { %v508_v20 = vmax.f32 %v483_v49, 0.0  ;;  %v486_v38 = vpop.f32.mrb[12].mxu1 }
 0x264   :  { %v1789_v59 = vpack.c.bf16 %v507_v56, %v505_v55  ;;  %v488_v39 = vpop.f32.mrb[13].mxu1  ;;  %v487_v62 = vadd.f32 %v486_v38, %v352_v60 }
 0x265   :  { %v1787_v61 = vpack.c.bf16 %v508_v20, %v506_v57  ;;  %v489_v8 = vadd.f32 %v488_v39, %v352_v60 }
 0x266   :  { %v509_v22 = vmax.f32 %v487_v62, 0.0 }
 0x267   :  { %v492_v9 = vpop.f32.mrb[14].mxu1  ;;  %1788 = vmatprep.subr.bf16.mxu0 %v1787_v61  ;;  %v510_v24 = vmax.f32 %v489_v8, 0.0 }
 0x268   :  { %v493_v17 = vadd.f32 %v492_v9, %v357_v4  ;;  %v494_v13 = vpop.f32.mrb[15].mxu1  ;;  %1790 = vmatpush1.bf16.msra.mxu0 %v1789_v59 }
 0x269   :  { %v495_v21 = vadd.f32 %v494_v13, %v357_v4 }
 0x26a   :  { %v511_v23 = vmax.f32 %v493_v17, 0.0 }
 0x26b   :  { %v512_v25 = vmax.f32 %v495_v21, 0.0 }
 0x26c   :  { %v1794_v26 = vpack.c.bf16 %v511_v23, %v509_v22  ;;  %v1701_v23 = vld [vmem:[%s2756_s4 + $0x58] sm:$0xff] }
 0x26d   :  { %v1791_v29 = vpack.c.bf16 %v512_v25, %v510_v24  ;;  %v1702_v24 = vld [vmem:[%s2756_s4 + $0x60] sm:$0xff]  ;;  %v1703_v25 = vld [vmem:[%s2756_s4 + $0x68] sm:$0xff] }
 0x26f   :  { %1793 = vmatprep.subr.msk.bf16.mxu0 %vm2263_vm14, %v1791_v29  ;;  %v1705_v29 = vld [vmem:[%s2756_s4 + $0x78] sm:$0x3f] }
 0x270   :  { %1796 = vmatpush1.bf16.msk.msra.mxu0 %vm2263_vm14, %v1794_v26  ;;  %v1704_v26 = vld [vmem:[%s2756_s4 + $0x70] sm:$0xff] }
 0x273   :  { %1683 = vmatmul.mubr.msk.f32.vlgmr.msra.gmra.mrb[2].mxu0 %vm513_vm15, %v2274_v30 }
 0x274   :  { %603 = vmatprep.mubr.f32.mxu0 %v1901_v3 }
 0x277   :  { %1684 = vmatmul.mubr.msk.f32.gmra.mrb[4].mxu0 %vm513_vm15, %v2282_v31 }
 0x278   :  { %609 = vmatprep.mubr.f32.mxu0 %v1901_v3 }
 0x27b   :  { %1685 = vmatmul.mubr.msk.f32.gmra.mrb[6].mxu0 %vm513_vm15, %v2290_v32 }
 0x27c   :  { %615 = vmatprep.mubr.f32.mxu0 %v1901_v3 }
 0x27f   :  { %1686 = vmatmul.mubr.msk.f32.gmra.mrb[8].mxu0 %vm513_vm15, %v2298_v35 }
 0x280   :  { %708 = vmatprep.mubr.f32.mxu0 %v1901_v3 }
 0x346   :  { %v599_v36 = vpop.f32.mrb[2].mxu0 }
 0x347   :  { %v601_v37 = vpop.f32.mrb[3].mxu0  ;;  %v622_v45 = vmul.f32 0.3, %v599_v36 }
 0x348   :  { %v623_v40 = vmul.f32 0.3, %v601_v37 }
 0x349   :  { %v2313_v59 = vsub.f32 %v1965_v2, %v622_v45 }
 0x34a   :  { %v605_v41 = vpop.f32.mrb[4].mxu0  ;;  %v2307_v57 = vsub.f32 %v1955_v0, %v623_v40 }
 0x34b   :  { %v624_v46 = vmul.f32 0.3, %v605_v41  ;;  %v607_v49 = vpop.f32.mrb[5].mxu0 }
 0x34c   :  { %v625_v55 = vmul.f32 0.3, %v607_v49 }
 0x34d   :  { %v2304_v56 = vsub.f32 %v1974_v5, %v624_v46 }
 0x34e   :  { %v2310_v20 = vsub.f32 %v1960_v1, %v625_v55  ;;  %v611_v38 = vpop.f32.mrb[6].mxu0 }
 0x34f   :  { %v613_v39 = vpop.f32.mrb[7].mxu0  ;;  %v1799_v61 = vpack.c.bf16 %v2304_v56, %v2313_v59  ;;  %v626_v4 = vmul.f32 0.3, %v611_v38 }
 0x350   :  { %v1797_v60 = vpack.c.bf16 %v2310_v20, %v2307_v57  ;;  %v627_v62 = vmul.f32 0.3, %v613_v39 }
 0x351   :  { %v2329_v13 = vsub.f32 %v1998_v11, %v626_v4 }
 0x352   :  { %v617_v5 = vpop.f32.mrb[8].mxu0  ;;  %1798 = vmatprep.subr.bf16.mxu0 %v1797_v60  ;;  %v2323_v2 = vsub.f32 %v1979_v6, %v627_v62 }
 0x353   :  { %v628_v0 = vmul.f32 0.3, %v617_v5  ;;  %v619_v8 = vpop.f32.mrb[9].mxu0  ;;  %1800 = vmatpush1.bf16.msra.mxu0 %v1799_v61 }
 0x354   :  { %v629_v1 = vmul.f32 0.3, %v619_v8 }
 0x355   :  { %v2320_v9 = vsub.f32 %v2003_v12, %v628_v0 }
 0x356   :  { %v2326_v17 = vsub.f32 %v1984_v7, %v629_v1 }
 0x357   :  { %v1804_v22 = vpack.c.bf16 %v2320_v9, %v2329_v13 }
 0x358   :  { %v1801_v21 = vpack.c.bf16 %v2326_v17, %v2323_v2 }
 0x35a   :  { %1803 = vmatprep.subr.msk.bf16.mxu0 %vm1991_vm2, %v1801_v21 }
 0x35b   :  { %1806 = vmatpush1.bf16.msk.msra.mxu0 %vm1991_vm2, %v1804_v22 }
 0x35e   :  { %1689 = vmatmul.mubr.msk.f32.vlgmr.msra.gmra.mrb[10].mxu0 %vm45_vm3, %v2014_v14  ;;  %v1698_v14 = vld [vmem:[%s2756_s4 + $0x40] sm:$0xff] }
 0x35f   :  { %1098 = vmatprep.mubr.f32.mxu0 %v1901_v3 }
 0x431   :  { %v710_v6 = vpop.f32.mrb[10].mxu0 }
 0x432   :  { %v2343_v7 = vsub.f32 %v710_v6, %v2022_v15  ;;  %v712_v11 = vpop.f32.mrb[11].mxu0  ;;  %v1699_v15 = vld [vmem:[%s2756_s4 + $0x48] sm:$0xff] }
 0x433   :  { %v2346_v12 = vsub.f32 %v712_v11, %v2030_v19  ;;  %v1700_v19 = vld [vmem:[%s2756_s4 + $0x50] sm:$0xff] }
 0x434   :  { %717 = vrot.lane.b32.xlu1 %v2343_v7, %s1904_s23 }
 0x435   :  { %719 = vrot.lane.b32.xlu0 %v2346_v12, %s1904_s23 }
 0x438   :  { %727 = vrot.lane.b32.xlu1 %v2343_v7, %s1903_s22 }
 0x439   :  { %729 = vrot.lane.b32.xlu0 %v2346_v12, %s1903_s22 }
 0x43c   :  { %737 = vrot.lane.b32.xlu1 %v2343_v7, %s1905_s24 }
 0x43d   :  { %739 = vrot.lane.b32.xlu0 %v2346_v12, %s1905_s24 }
 0x440   :  { %747 = vrot.lane.b32.xlu1 %v2343_v7, %s1906_s25 }
 0x441   :  { %749 = vrot.lane.b32.xlu0 %v2346_v12, %s1906_s25 }
 0x444   :  { %759 = vrot.lane.b32.xlu1 %v2343_v7, %s1907_s26 }
 0x445   :  { %761 = vrot.lane.b32.xlu0 %v2346_v12, %s1907_s26 }
 0x448   :  { %769 = vrot.lane.b32.xlu1 %v2343_v7, %s1908_s27 }
 0x449   :  { %771 = vrot.lane.b32.xlu0 %v2346_v12, %s1908_s27 }
 0x44c   :  { %779 = vrot.lane.b32.xlu1 %v2343_v7, %s1909_s28 }
 0x44d   :  { %781 = vrot.lane.b32.xlu0 %v2346_v12, %s1909_s28 }
 0x450   :  { %789 = vrot.lane.b32.xlu1 %v2343_v7, %s1910_s29 }
 0x451   :  { %791 = vrot.lane.b32.xlu0 %v2346_v12, %s1910_s29 }
 0x454   :  { %837 = vperm.xlu1 %1897, %v1698_v14  }
 0x455   :  { %842 = vperm.xlu0 %1896, %v1699_v15  }
 0x458   :  { %847 = vperm.xlu1 %1897, %v1700_v19  }
 0x459   :  { %852 = vperm.xlu0 %1896, %v1701_v23  }
 0x45c   :  { %857 = vperm.xlu1 %1897, %v1702_v24  }
 0x45d   :  { %862 = vperm.xlu0 %1896, %v1703_v25  }
 0x460   :  { %867 = vperm.xlu1 %1897, %v1704_v26  }
 0x461   :  { %872 = vperm.xlu0 %1896, %v1705_v29  }
 0x4a6   :  { %v718_v36 = vpop.permute.xlu1 %717 }
 0x4a7   :  { %v720_v37 = vpop.permute.xlu0 %719 }
 0x4a8   :  { %v721_v40 = vsel %vm135_vm7, %v718_v36, %v720_v37  ;;  %v722_v41 = vsel %vm135_vm7, %v720_v37, %v718_v36 }
 0x4a9   :  { %v723_v38 = vmul.f32 %v722_v41, %v2128_v51  ;;  %v724_v39 = vmul.f32 %v721_v40, %v2131_v52 }
 0x4aa   :  { %v728_v45 = vpop.permute.xlu1 %727 }
 0x4ab   :  { %v730_v46 = vpop.permute.xlu0 %729 }
 0x4ac   :  { %v731_v49 = vsel %vm154_vm4, %v728_v45, %v730_v46  ;;  %v732_v55 = vsel %vm154_vm4, %v730_v46, %v728_v45 }
 0x4ad   :  { %v733_v60 = vmul.f32 %v732_v55, %v2111_v43  ;;  %v734_v61 = vmul.f32 %v731_v49, %v2115_v47 }
 0x4ae   :  { %v738_v62 = vpop.permute.xlu1 %737 }
 0x4af   :  { %v1809_v5 = vpack.c.bf16 %v733_v60, %v723_v38  ;;  %v740_v4 = vpop.permute.xlu0 %739  ;;  %v1807_v0 = vpack.c.bf16 %v734_v61, %v724_v39 }
 0x4b0   :  { %v741_v8 = vsel %vm173_vm5, %v738_v62, %v740_v4  ;;  %v742_v1 = vsel %vm173_vm5, %v740_v4, %v738_v62 }
 0x4b1   :  { %1808 = vmatprep.subr.bf16.mxu1 %v1807_v0  ;;  %v743_v14 = vmul.f32 %v742_v1, %v2159_v16  ;;  %v744_v15 = vmul.f32 %v741_v8, %v2134_v53 }
 0x4b2   :  { %v748_v21 = vpop.permute.xlu1 %747  ;;  %1810 = vmatpush1.bf16.msra.mxu1 %v1809_v5 }
 0x4b3   :  { %v750_v22 = vpop.permute.xlu0 %749 }
 0x4b4   :  { %v751_v6 = vsel %vm192_vm6, %v748_v21, %v750_v22  ;;  %v752_v11 = vsel %vm192_vm6, %v750_v22, %v748_v21 }
 0x4b5   :  { %v753_v19 = vmul.f32 %v752_v11, %v2137_v54  ;;  %v754_v23 = vmul.f32 %v751_v6, %v2124_v50 }
 0x4b6   :  { %v760_v24 = vpop.permute.xlu1 %759 }
 0x4b7   :  { %v1813_v25 = vpack.c.bf16 %v753_v19, %v743_v14  ;;  %v762_v26 = vpop.permute.xlu0 %761  ;;  %v1811_v29 = vpack.c.bf16 %v754_v23, %v744_v15  ;;  %v1690_v19 = vld [vmem:[%s2758_s3 + $0x40] sm:$0xff]  ;;  %v1691_v23 = vld [vmem:[%s2758_s3 + $0x48] sm:$0xff] }
 0x4b8   :  { %v763_v36 = vsel %vm213_vm8, %v760_v24, %v762_v26  ;;  %v764_v37 = vsel %vm213_vm8, %v762_v26, %v760_v24  ;;  %v1692_v24 = vld [vmem:[%s2758_s3 + $0x50] sm:$0xff]  ;;  %v1694_v26 = vld [vmem:[%s2758_s3 + $0x60] sm:$0xff] }
 0x4b9   :  { %v765_v40 = vmul.f32 %v763_v36, %v2166_v27  ;;  %v766_v41 = vmul.f32 %v764_v37, %v2142_v58  ;;  %1812 = vmatprep.subr.bf16.mxu1 %v1811_v29  ;;  %v1695_v29 = vld [vmem:[%s2758_s3 + $0x68] sm:$0xff]  ;;  %v1696_v36 = vld [vmem:[%s2758_s3 + $0x70] sm:$0xff]  ;;  %v1697_v37 = vld [vmem:[%s2758_s3 + $0x78] sm:$0x3f] }
 0x4ba   :  { %v770_v45 = vpop.permute.xlu1 %769  ;;  %1814 = vmatpush1.bf16.msra.mxu1 %v1813_v25  ;;  %v1693_v25 = vld [vmem:[%s2758_s3 + $0x58] sm:$0xff] }
 0x4bb   :  { %v1817_v46 = vpack.c.bf16 %v765_v40, %v2343_v7  ;;  %v772_v49 = vpop.permute.xlu0 %771  ;;  %v1815_v55 = vpack.c.bf16 %v766_v41, %v2346_v12 }
 0x4bc   :  { %v773_v38 = vsel %vm232_vm9, %v770_v45, %v772_v49  ;;  %v774_v39 = vsel %vm232_vm9, %v772_v49, %v770_v45 }
 0x4bd   :  { %1816 = vmatprep.subr.bf16.mxu1 %v1815_v55  ;;  %v775_v7 = vmul.f32 %v773_v38, %v2179_v42  ;;  %v776_v12 = vmul.f32 %v774_v39, %v2182_v44 }
 0x4be   :  { %v780_v60 = vpop.permute.xlu1 %779  ;;  %1818 = vmatpush1.bf16.msra.mxu1 %v1817_v46 }
 0x4bf   :  { %v782_v61 = vpop.permute.xlu0 %781 }
 0x4c0   :  { %v783_v62 = vsel %vm251_vm10, %v780_v60, %v782_v61  ;;  %v784_v5 = vsel %vm251_vm10, %v782_v61, %v780_v60 }
 0x4c1   :  { %v785_v4 = vmul.f32 %v783_v62, %v2187_v33  ;;  %v786_v0 = vmul.f32 %v784_v5, %v2190_v48 }
 0x4c2   :  { %v790_v8 = vpop.permute.xlu1 %789 }
 0x4c3   :  { %v1821_v1 = vpack.c.bf16 %v785_v4, %v775_v7  ;;  %v792_v21 = vpop.permute.xlu0 %791  ;;  %v1819_v22 = vpack.c.bf16 %v786_v0, %v776_v12 }
 0x4c4   :  { %v794_v6 = vsel %vm270_vm11, %v792_v21, %v790_v8  ;;  %v793_v11 = vsel %vm270_vm11, %v790_v8, %v792_v21 }
 0x4c5   :  { %v796_v14 = vmul.f32 %v2209_v63, %v794_v6  ;;  %1820 = vmatprep.subr.bf16.mxu1 %v1819_v22  ;;  %v795_v15 = vmul.f32 %v2216_v18, %v793_v11 }
 0x4c6   :  { %1822 = vmatpush1.bf16.msra.mxu1 %v1821_v1 }
 0x4c7   :  { %915 = vmatprep.subr.mxu1 %v796_v14 }
 0x4ca   :  { %916 = vmatpush1.msra.mxu1 %v795_v15 }
 0x4cb   :  { %1706 = vmatmul.mubr.msk.f32.vlgmr.msra.gmra.mrb[16].mxu1 %vm359_vm12, %v1690_v19 }
 0x4cc   :  { %969 = vmatprep.mubr.f32.mxu1 %v1901_v3 }
 0x4cf   :  { %1707 = vmatmul.mubr.msk.f32.gmra.mrb[18].mxu1 %vm359_vm12, %v1691_v23 }
 0x4d0   :  { %975 = vmatprep.mubr.f32.mxu1 %v1901_v3 }
 0x4d3   :  { %1708 = vmatmul.mubr.msk.f32.gmra.mrb[20].mxu1 %vm359_vm12, %v1692_v24  ;;  %v838_v45 = vpop.permute.xlu1 %837 }
 0x4d4   :  { %981 = vmatprep.mubr.f32.mxu1 %v1901_v3  ;;  %v843_v49 = vpop.permute.xlu0 %842 }
 0x4d7   :  { %1709 = vmatmul.mubr.msk.f32.gmra.mrb[22].mxu1 %vm359_vm12, %v1693_v25  ;;  %v848_v1 = vpop.permute.xlu1 %847 }
 0x4d8   :  { %987 = vmatprep.mubr.f32.mxu1 %v1901_v3  ;;  %v853_v6 = vpop.permute.xlu0 %852 }
 0x4db   :  { %1710 = vmatmul.mubr.msk.f32.gmra.mrb[24].mxu1 %vm359_vm12, %v1694_v26 }
 0x4dc   :  { %993 = vmatprep.mubr.f32.mxu1 %v1901_v3 }
 0x4df   :  { %1711 = vmatmul.mubr.msk.f32.gmra.mrb[26].mxu1 %vm359_vm12, %v1695_v29 }
 0x4e0   :  { %999 = vmatprep.mubr.f32.mxu1 %v1901_v3 }
 0x4e3   :  { %1712 = vmatmul.mubr.msk.f32.gmra.mrb[28].mxu1 %vm359_vm12, %v1696_v36 }
 0x4e4   :  { %1005 = vmatprep.mubr.f32.mxu1 %v1901_v3 }
 0x4e7   :  { %1713 = vmatmul.mubr.msk.f32.gmra.mrb[30].mxu1 %vm359_vm12, %v1697_v37 }
 0x4e8   :  { %1464 = vmatprep.mubr.f32.mxu1 %v1901_v3 }
 0x59e   :  { %v965_v40 = vpop.f32.mrb[16].mxu1 }
 0x59f   :  { %v967_v41 = vpop.f32.mrb[17].mxu1  ;;  %v966_v46 = vadd.f32 %v965_v40, %v838_v45 }
 0x5a0   :  { %v968_v55 = vadd.f32 %v967_v41, %v838_v45  ;;  %v858_v41 = vpop.permute.xlu1 %857 }
 0x5a1   :  { %v1012_v62 = vmax.f32 %v966_v46, 0.0 }
 0x5a2   :  { %v971_v38 = vpop.f32.mrb[18].mxu1  ;;  %v1013_v7 = vmax.f32 %v968_v55, 0.0 }
 0x5a3   :  { %v972_v39 = vadd.f32 %v971_v38, %v843_v49  ;;  %v973_v60 = vpop.f32.mrb[19].mxu1 }
 0x5a4   :  { %v974_v61 = vadd.f32 %v973_v60, %v843_v49  ;;  %v863_v49 = vpop.permute.xlu0 %862 }
 0x5a5   :  { %v1014_v5 = vmax.f32 %v972_v39, 0.0 }
 0x5a6   :  { %v1015_v12 = vmax.f32 %v974_v61, 0.0  ;;  %v977_v4 = vpop.f32.mrb[20].mxu1 }
 0x5a7   :  { %v1825_v0 = vpack.c.bf16 %v1014_v5, %v1012_v62  ;;  %v979_v8 = vpop.f32.mrb[21].mxu1  ;;  %v978_v22 = vadd.f32 %v977_v4, %v848_v1 }
 0x5a8   :  { %v1823_v21 = vpack.c.bf16 %v1015_v12, %v1013_v7  ;;  %v980_v11 = vadd.f32 %v979_v8, %v848_v1  ;;  %v868_v1 = vpop.permute.xlu1 %867 }
 0x5a9   :  { %v1016_v24 = vmax.f32 %v978_v22, 0.0 }
 0x5aa   :  { %v983_v14 = vpop.f32.mrb[22].mxu1  ;;  %1824 = vmatprep.subr.bf16.mxu0 %v1823_v21  ;;  %v1017_v26 = vmax.f32 %v980_v11, 0.0 }
 0x5ab   :  { %v984_v15 = vadd.f32 %v983_v14, %v853_v6  ;;  %v985_v19 = vpop.f32.mrb[23].mxu1  ;;  %1826 = vmatpush1.bf16.msra.mxu0 %v1825_v0 }
 0x5ac   :  { %v986_v23 = vadd.f32 %v985_v19, %v853_v6  ;;  %v873_v6 = vpop.permute.xlu0 %872 }
 0x5ad   :  { %v1018_v25 = vmax.f32 %v984_v15, 0.0 }
 0x5ae   :  { %v1019_v29 = vmax.f32 %v986_v23, 0.0  ;;  %v989_v36 = vpop.f32.mrb[24].mxu1 }
 0x5af   :  { %v1829_v37 = vpack.c.bf16 %v1018_v25, %v1016_v24  ;;  %v991_v40 = vpop.f32.mrb[25].mxu1  ;;  %v990_v46 = vadd.f32 %v989_v36, %v858_v41 }
 0x5b0   :  { %v1827_v45 = vpack.c.bf16 %v1019_v29, %v1017_v26  ;;  %v992_v55 = vadd.f32 %v991_v40, %v858_v41 }
 0x5b1   :  { %v1020_v62 = vmax.f32 %v990_v46, 0.0 }
 0x5b2   :  { %v995_v38 = vpop.f32.mrb[26].mxu1  ;;  %1828 = vmatprep.subr.bf16.mxu0 %v1827_v45  ;;  %v1021_v7 = vmax.f32 %v992_v55, 0.0 }
 0x5b3   :  { %v996_v39 = vadd.f32 %v995_v38, %v863_v49  ;;  %v997_v60 = vpop.f32.mrb[27].mxu1  ;;  %1830 = vmatpush1.bf16.msra.mxu0 %v1829_v37 }
 0x5b4   :  { %v998_v61 = vadd.f32 %v997_v60, %v863_v49 }
 0x5b5   :  { %v1022_v5 = vmax.f32 %v996_v39, 0.0 }
 0x5b6   :  { %v1023_v12 = vmax.f32 %v998_v61, 0.0  ;;  %v1001_v4 = vpop.f32.mrb[28].mxu1 }
 0x5b7   :  { %v1833_v0 = vpack.c.bf16 %v1022_v5, %v1020_v62  ;;  %v1003_v8 = vpop.f32.mrb[29].mxu1  ;;  %v1002_v22 = vadd.f32 %v1001_v4, %v868_v1 }
 0x5b8   :  { %v1831_v21 = vpack.c.bf16 %v1023_v12, %v1021_v7  ;;  %v1004_v11 = vadd.f32 %v1003_v8, %v868_v1 }
 0x5b9   :  { %v1024_v24 = vmax.f32 %v1002_v22, 0.0 }
 0x5ba   :  { %v1007_v14 = vpop.f32.mrb[30].mxu1  ;;  %1832 = vmatprep.subr.bf16.mxu0 %v1831_v21  ;;  %v1025_v26 = vmax.f32 %v1004_v11, 0.0 }
 0x5bb   :  { %v1008_v15 = vadd.f32 %v1007_v14, %v873_v6  ;;  %v1009_v19 = vpop.f32.mrb[31].mxu1  ;;  %1834 = vmatpush1.bf16.msra.mxu0 %v1833_v0 }
 0x5bc   :  { %v1010_v23 = vadd.f32 %v1009_v19, %v873_v6 }
 0x5bd   :  { %v1026_v25 = vmax.f32 %v1008_v15, 0.0 }
 0x5be   :  { %v1027_v29 = vmax.f32 %v1010_v23, 0.0 }
 0x5bf   :  { %v1838_v36 = vpack.c.bf16 %v1026_v25, %v1024_v24  ;;  %v1731_v24 = vld [vmem:[%s2756_s4 + $0x80] sm:$0xff]  ;;  %v1732_v25 = vld [vmem:[%s2756_s4 + $0x88] sm:$0xff] }
 0x5c0   :  { %v1835_v37 = vpack.c.bf16 %v1027_v29, %v1025_v26  ;;  %v1733_v26 = vld [vmem:[%s2756_s4 + $0x90] sm:$0xff]  ;;  %v1734_v29 = vld [vmem:[%s2756_s4 + $0x98] sm:$0xff] }
 0x5c2   :  { %1837 = vmatprep.subr.msk.bf16.mxu0 %vm2263_vm14, %v1835_v37  ;;  %v1736_v37 = vld [vmem:[%s2756_s4 + $0xa8] sm:$0xff] }
 0x5c3   :  { %1840 = vmatpush1.bf16.msk.msra.mxu0 %vm2263_vm14, %v1838_v36  ;;  %v1735_v36 = vld [vmem:[%s2756_s4 + $0xa0] sm:$0xff] }
 0x5c6   :  { %1716 = vmatmul.mubr.msk.f32.vlgmr.msra.gmra.mrb[12].mxu0 %vm513_vm15, %v2274_v30 }
 0x5c7   :  { %1104 = vmatprep.mubr.f32.mxu0 %v1901_v3 }
 0x5ca   :  { %1717 = vmatmul.mubr.msk.f32.gmra.mrb[14].mxu0 %vm513_vm15, %v2282_v31 }
 0x5cb   :  { %1110 = vmatprep.mubr.f32.mxu0 %v1901_v3 }
 0x5ce   :  { %1718 = vmatmul.mubr.msk.f32.gmra.mrb[16].mxu0 %vm513_vm15, %v2290_v32 }
 0x5cf   :  { %1116 = vmatprep.mubr.f32.mxu0 %v1901_v3 }
 0x5d2   :  { %1719 = vmatmul.mubr.msk.f32.gmra.mrb[18].mxu0 %vm513_vm15, %v2298_v35 }
 0x5d3   :  { %1209 = vmatprep.mubr.f32.mxu0 %v1901_v3 }
 0x699   :  { %v1100_v40 = vpop.f32.mrb[12].mxu0 }
 0x69a   :  { %v1102_v41 = vpop.f32.mrb[13].mxu0  ;;  %v1123_v49 = vmul.f32 0.3, %v1100_v40  ;;  %v1737_v40 = vld [vmem:[%s2756_s4 + $0xb0] sm:$0xff] }
 0x69b   :  { %v1124_v45 = vmul.f32 0.3, %v1102_v41  ;;  %v1738_v41 = vld [vmem:[%s2756_s4 + $0xb8] sm:$0x3f] }
 0x69c   :  { %v2520_v7 = vsub.f32 %v2313_v59, %v1123_v49 }
 0x69d   :  { %v1106_v46 = vpop.f32.mrb[14].mxu0  ;;  %v2514_v61 = vsub.f32 %v2307_v57, %v1124_v45 }
 0x69e   :  { %v1125_v55 = vmul.f32 0.3, %v1106_v46  ;;  %v1108_v38 = vpop.f32.mrb[15].mxu0 }
 0x69f   :  { %v1126_v39 = vmul.f32 0.3, %v1108_v38 }
 0x6a0   :  { %v2511_v60 = vsub.f32 %v2304_v56, %v1125_v55 }
 0x6a1   :  { %v2517_v62 = vsub.f32 %v2310_v20, %v1126_v39  ;;  %v1112_v5 = vpop.f32.mrb[16].mxu0 }
 0x6a2   :  { %v1114_v12 = vpop.f32.mrb[17].mxu0  ;;  %v1843_v0 = vpack.c.bf16 %v2511_v60, %v2520_v7  ;;  %v1127_v1 = vmul.f32 0.3, %v1112_v5 }
 0x6a3   :  { %v1841_v4 = vpack.c.bf16 %v2517_v62, %v2514_v61  ;;  %v1128_v8 = vmul.f32 0.3, %v1114_v12 }
 0x6a4   :  { %v2536_v11 = vsub.f32 %v2329_v13, %v1127_v1 }
 0x6a5   :  { %v1118_v56 = vpop.f32.mrb[18].mxu0  ;;  %1842 = vmatprep.subr.bf16.mxu0 %v1841_v4  ;;  %v2530_v59 = vsub.f32 %v2323_v2, %v1128_v8 }
 0x6a6   :  { %v1129_v57 = vmul.f32 0.3, %v1118_v56  ;;  %v1120_v21 = vpop.f32.mrb[19].mxu0  ;;  %1844 = vmatpush1.bf16.msra.mxu0 %v1843_v0 }
 0x6a7   :  { %v1130_v20 = vmul.f32 0.3, %v1120_v21 }
 0x6a8   :  { %v2527_v22 = vsub.f32 %v2320_v9, %v1129_v57  ;;  %v1898_v9 = vld [vmem:[%s2754_s2] sm:$0xff] }
 0x6a9   :  { %v2533_v6 = vsub.f32 %v2326_v17, %v1130_v20  ;;  %v1899_v17 = vld [vmem:[%s2755_s1] sm:$0xff] }
 0x6aa   :  { %v1848_v15 = vpack.c.bf16 %v2527_v22, %v2536_v11 }
 0x6ab   :  { %v1845_v14 = vpack.c.bf16 %v2533_v6, %v2530_v59 }
 0x6ad   :  { %1847 = vmatprep.subr.msk.bf16.mxu0 %vm1991_vm2, %v1845_v14 }
 0x6ae   :  { %1850 = vmatpush1.bf16.msk.msra.mxu0 %vm1991_vm2, %v1848_v15 }
 0x6b1   :  { %1722 = vmatmul.mubr.msk.f32.vlgmr.msra.gmra.mrb[20].mxu0 %vm45_vm3, %v1898_v9 }
 0x6b2   :  { %1599 = vmatprep.mubr.f32.mxu0 %v1901_v3 }
 0x784   :  { %v1211_v2 = vpop.f32.mrb[20].mxu0 }
 0x785   :  { %v2554_v13 = vsub.f32 %v1211_v2, %v1899_v17  ;;  %v1213_v19 = vpop.f32.mrb[21].mxu0 }
 0x786   :  { %v2559_v23 = vsub.f32 %v1213_v19, %v1900_v10 }
 0x787   :  { %1218 = vrot.lane.b32.xlu1 %v2554_v13, %s1904_s23 }
 0x788   :  { %1220 = vrot.lane.b32.xlu0 %v2559_v23, %s1904_s23 }
 0x78b   :  { %1228 = vrot.lane.b32.xlu1 %v2554_v13, %s1903_s22 }
 0x78c   :  { %1230 = vrot.lane.b32.xlu0 %v2559_v23, %s1903_s22 }
 0x78f   :  { %1238 = vrot.lane.b32.xlu1 %v2554_v13, %s1905_s24 }
 0x790   :  { %1240 = vrot.lane.b32.xlu0 %v2559_v23, %s1905_s24 }
 0x793   :  { %1248 = vrot.lane.b32.xlu1 %v2554_v13, %s1906_s25 }
 0x794   :  { %1250 = vrot.lane.b32.xlu0 %v2559_v23, %s1906_s25 }
 0x797   :  { %1260 = vrot.lane.b32.xlu1 %v2554_v13, %s1907_s26 }
 0x798   :  { %1262 = vrot.lane.b32.xlu0 %v2559_v23, %s1907_s26 }
 0x79b   :  { %1270 = vrot.lane.b32.xlu1 %v2554_v13, %s1908_s27 }
 0x79c   :  { %1272 = vrot.lane.b32.xlu0 %v2559_v23, %s1908_s27 }
 0x79f   :  { %1280 = vrot.lane.b32.xlu1 %v2554_v13, %s1909_s28 }
 0x7a0   :  { %1282 = vrot.lane.b32.xlu0 %v2559_v23, %s1909_s28 }
 0x7a3   :  { %1290 = vrot.lane.b32.xlu1 %v2554_v13, %s1910_s29 }
 0x7a4   :  { %1292 = vrot.lane.b32.xlu0 %v2559_v23, %s1910_s29 }
 0x7a7   :  { %1338 = vperm.xlu1 %1897, %v1731_v24  }
 0x7a8   :  { %1343 = vperm.xlu0 %1896, %v1732_v25  }
 0x7ab   :  { %1348 = vperm.xlu1 %1897, %v1733_v26  }
 0x7ac   :  { %1353 = vperm.xlu0 %1896, %v1734_v29  }
 0x7af   :  { %1358 = vperm.xlu1 %1897, %v1735_v36  }
 0x7b0   :  { %1363 = vperm.xlu0 %1896, %v1736_v37  }
 0x7b3   :  { %1368 = vperm.xlu1 %1897, %v1737_v40  }
 0x7b4   :  { %1373 = vperm.xlu0 %1896, %v1738_v41  }
 0x7f9   :  { %v1219_v45 = vpop.permute.xlu1 %1218 }
 0x7fa   :  { %v1221_v46 = vpop.permute.xlu0 %1220 }
 0x7fb   :  { %v1222_v49 = vsel %vm135_vm7, %v1219_v45, %v1221_v46  ;;  %v1223_v55 = vsel %vm135_vm7, %v1221_v46, %v1219_v45 }
 0x7fc   :  { %v1224_v4 = vmul.f32 %v1223_v55, %v2128_v51  ;;  %v1225_v0 = vmul.f32 %v1222_v49, %v2131_v52 }
 0x7fd   :  { %v1229_v38 = vpop.permute.xlu1 %1228 }
 0x7fe   :  { %v1231_v39 = vpop.permute.xlu0 %1230 }
 0x7ff   :  { %v1232_v5 = vsel %vm154_vm4, %v1229_v38, %v1231_v39  ;;  %v1233_v12 = vsel %vm154_vm4, %v1231_v39, %v1229_v38 }
 0x800   :  { %v1234_v8 = vmul.f32 %v1233_v12, %v2111_v43  ;;  %v1235_v56 = vmul.f32 %v1232_v5, %v2115_v47 }
 0x801   :  { %v1239_v1 = vpop.permute.xlu1 %1238 }
 0x802   :  { %v1853_v57 = vpack.c.bf16 %v1234_v8, %v1224_v4  ;;  %v1241_v21 = vpop.permute.xlu0 %1240  ;;  %v1851_v20 = vpack.c.bf16 %v1235_v56, %v1225_v0 }
 0x803   :  { %v1242_v14 = vsel %vm173_vm5, %v1239_v1, %v1241_v21  ;;  %v1243_v15 = vsel %vm173_vm5, %v1241_v21, %v1239_v1  ;;  %v1729_v1 = vld [vmem:[%s2758_s3 + $0xb0] sm:$0xff] }
 0x804   :  { %1852 = vmatprep.subr.bf16.mxu1 %v1851_v20  ;;  %v1244_v47 = vmul.f32 %v1243_v15, %v2159_v16  ;;  %v1245_v2 = vmul.f32 %v1242_v14, %v2134_v53 }
 0x805   :  { %v1249_v9 = vpop.permute.xlu1 %1248  ;;  %1854 = vmatpush1.bf16.msra.mxu1 %v1853_v57  ;;  %v1730_v57 = vld [vmem:[%s2758_s3 + $0xb8] sm:$0x3f] }
 0x806   :  { %v1251_v51 = vpop.permute.xlu0 %1250 }
 0x807   :  { %v1252_v52 = vsel %vm192_vm6, %v1249_v9, %v1251_v51  ;;  %v1253_v43 = vsel %vm192_vm6, %v1251_v51, %v1249_v9 }
 0x808   :  { %v1254_v17 = vmul.f32 %v1253_v43, %v2137_v54  ;;  %v1255_v19 = vmul.f32 %v1252_v52, %v2124_v50 }
 0x809   :  { %v1261_v10 = vpop.permute.xlu1 %1260 }
 0x80a   :  { %v1857_v24 = vpack.c.bf16 %v1254_v17, %v1244_v47  ;;  %v1263_v25 = vpop.permute.xlu0 %1262  ;;  %v1855_v26 = vpack.c.bf16 %v1255_v19, %v1245_v2 }
 0x80b   :  { %v1264_v29 = vsel %vm213_vm8, %v1261_v10, %v1263_v25  ;;  %v1265_v36 = vsel %vm213_vm8, %v1263_v25, %v1261_v10 }
 0x80c   :  { %v1266_v37 = vmul.f32 %v1264_v29, %v2166_v27  ;;  %v1267_v16 = vmul.f32 %v1265_v36, %v2142_v58  ;;  %1856 = vmatprep.subr.bf16.mxu1 %v1855_v26 }
 0x80d   :  { %v1271_v53 = vpop.permute.xlu1 %1270  ;;  %1858 = vmatpush1.bf16.msra.mxu1 %v1857_v24 }
 0x80e   :  { %v1861_v54 = vpack.c.bf16 %v1266_v37, %v2554_v13  ;;  %v1273_v50 = vpop.permute.xlu0 %1272  ;;  %v1859_v40 = vpack.c.bf16 %v1267_v16, %v2559_v23 }
 0x80f   :  { %v1274_v41 = vsel %vm232_vm9, %v1271_v53, %v1273_v50  ;;  %v1275_v45 = vsel %vm232_vm9, %v1273_v50, %v1271_v53 }
 0x810   :  { %1860 = vmatprep.subr.bf16.mxu1 %v1859_v40  ;;  %v1276_v13 = vmul.f32 %v1274_v41, %v2179_v42  ;;  %v1277_v23 = vmul.f32 %v1275_v45, %v2182_v44  ;;  %v1723_v44 = vld [vmem:[%s2758_s3 + $0x80] sm:$0xff] }
 0x811   :  { %v1281_v46 = vpop.permute.xlu1 %1280  ;;  %1862 = vmatpush1.bf16.msra.mxu1 %v1861_v54 }
 0x812   :  { %v1283_v27 = vpop.permute.xlu0 %1282 }
 0x813   :  { %v1284_v58 = vsel %vm251_vm10, %v1281_v46, %v1283_v27  ;;  %v1285_v49 = vsel %vm251_vm10, %v1283_v27, %v1281_v46 }
 0x814   :  { %v1286_v55 = vmul.f32 %v1284_v58, %v2187_v33  ;;  %v1287_v38 = vmul.f32 %v1285_v49, %v2190_v48  ;;  %v1725_v33 = vld [vmem:[%s2758_s3 + $0x90] sm:$0xff]  ;;  %v1726_v48 = vld [vmem:[%s2758_s3 + $0x98] sm:$0xff] }
 0x815   :  { %v1291_v39 = vpop.permute.xlu1 %1290 }
 0x816   :  { %v1865_v5 = vpack.c.bf16 %v1286_v55, %v1276_v13  ;;  %v1293_v12 = vpop.permute.xlu0 %1292  ;;  %v1863_v4 = vpack.c.bf16 %v1287_v38, %v1277_v23 }
 0x817   :  { %v1295_v0 = vsel %vm270_vm11, %v1293_v12, %v1291_v39  ;;  %v1294_v8 = vsel %vm270_vm11, %v1291_v39, %v1293_v12 }
 0x818   :  { %v1297_v56 = vmul.f32 %v2209_v63, %v1295_v0  ;;  %1864 = vmatprep.subr.bf16.mxu1 %v1863_v4  ;;  %v1296_v42 = vmul.f32 %v2216_v18, %v1294_v8  ;;  %v1727_v63 = vld [vmem:[%s2758_s3 + $0xa0] sm:$0xff]  ;;  %v1728_v18 = vld [vmem:[%s2758_s3 + $0xa8] sm:$0xff] }
 0x819   :  { %1866 = vmatpush1.bf16.msra.mxu1 %v1865_v5 }
 0x81a   :  { %1416 = vmatprep.subr.mxu1 %v1297_v56 }
 0x81d   :  { %1417 = vmatpush1.msra.mxu1 %v1296_v42 }
 0x81e   :  { %1739 = vmatmul.mubr.msk.f32.vlgmr.msra.gmra.mrb[32].mxu1 %vm359_vm12, %v1723_v44 }
 0x81f   :  { %1470 = vmatprep.mubr.f32.mxu1 %v1901_v3 }
 0x822   :  { %1740 = vmatmul.mubr.msk.f32.gmra.mrb[34].mxu1 %vm359_vm12, %v1724_v34 }
 0x823   :  { %1476 = vmatprep.mubr.f32.mxu1 %v1901_v3 }
 0x826   :  { %1741 = vmatmul.mubr.msk.f32.gmra.mrb[36].mxu1 %vm359_vm12, %v1725_v33  ;;  %v1339_v14 = vpop.permute.xlu1 %1338 }
 0x827   :  { %1482 = vmatprep.mubr.f32.mxu1 %v1901_v3  ;;  %v1344_v9 = vpop.permute.xlu0 %1343 }
 0x82a   :  { %1742 = vmatmul.mubr.msk.f32.gmra.mrb[38].mxu1 %vm359_vm12, %v1726_v48  ;;  %v1349_v36 = vpop.permute.xlu1 %1348 }
 0x82b   :  { %1488 = vmatprep.mubr.f32.mxu1 %v1901_v3  ;;  %v1354_v53 = vpop.permute.xlu0 %1353 }
 0x82e   :  { %1743 = vmatmul.mubr.msk.f32.gmra.mrb[40].mxu1 %vm359_vm12, %v1727_v63  ;;  %v1359_v38 = vpop.permute.xlu1 %1358 }
 0x82f   :  { %1494 = vmatprep.mubr.f32.mxu1 %v1901_v3  ;;  %v1364_v12 = vpop.permute.xlu0 %1363 }
 0x832   :  { %1744 = vmatmul.mubr.msk.f32.gmra.mrb[42].mxu1 %vm359_vm12, %v1728_v18 }
 0x833   :  { %1500 = vmatprep.mubr.f32.mxu1 %v1901_v3 }
 0x836   :  { %1745 = vmatmul.mubr.msk.f32.gmra.mrb[44].mxu1 %vm359_vm12, %v1729_v1 }
 0x837   :  { %1506 = vmatprep.mubr.f32.mxu1 %v1901_v3 }
 0x83a   :  { %1746 = vmatmul.mubr.msk.f32.gmra.mrb[46].mxu1 %vm359_vm12, %v1730_v57  ;;  %v1369_v57 = vpop.permute.xlu1 %1368 }
 0x8f1   :  { %v1466_v21 = vpop.f32.mrb[32].mxu1 }
 0x8f2   :  { %v1468_v20 = vpop.f32.mrb[33].mxu1  ;;  %v1467_v15 = vadd.f32 %v1466_v21, %v1339_v14 }
 0x8f3   :  { %v1469_v51 = vadd.f32 %v1468_v20, %v1339_v14  ;;  %v1374_v14 = vpop.permute.xlu0 %1373 }
 0x8f4   :  { %v1513_v17 = vmax.f32 %v1467_v15, 0.0 }
 0x8f5   :  { %v1472_v52 = vpop.f32.mrb[34].mxu1  ;;  %v1514_v10 = vmax.f32 %v1469_v51, 0.0 }
 0x8f6   :  { %v1473_v43 = vadd.f32 %v1472_v52, %v1344_v9  ;;  %v1474_v47 = vpop.f32.mrb[35].mxu1 }
 0x8f7   :  { %v1475_v2 = vadd.f32 %v1474_v47, %v1344_v9 }
 0x8f8   :  { %v1515_v19 = vmax.f32 %v1473_v43, 0.0 }
 0x8f9   :  { %v1516_v24 = vmax.f32 %v1475_v2, 0.0  ;;  %v1478_v25 = vpop.f32.mrb[36].mxu1 }
 0x8fa   :  { %v1869_v26 = vpack.c.bf16 %v1515_v19, %v1513_v17  ;;  %v1480_v29 = vpop.f32.mrb[37].mxu1  ;;  %v1479_v16 = vadd.f32 %v1478_v25, %v1349_v36 }
 0x8fb   :  { %v1867_v37 = vpack.c.bf16 %v1516_v24, %v1514_v10  ;;  %v1481_v54 = vadd.f32 %v1480_v29, %v1349_v36 }
 0x8fc   :  { %v1517_v46 = vmax.f32 %v1479_v16, 0.0 }
 0x8fd   :  { %v1484_v50 = vpop.f32.mrb[38].mxu1  ;;  %1868 = vmatprep.subr.bf16.mxu0 %v1867_v37  ;;  %v1518_v58 = vmax.f32 %v1481_v54, 0.0 }
 0x8fe   :  { %v1485_v40 = vadd.f32 %v1484_v50, %v1354_v53  ;;  %v1486_v41 = vpop.f32.mrb[39].mxu1  ;;  %1870 = vmatpush1.bf16.msra.mxu0 %v1869_v26 }
 0x8ff   :  { %v1487_v45 = vadd.f32 %v1486_v41, %v1354_v53 }
 0x900   :  { %v1519_v27 = vmax.f32 %v1485_v40, 0.0 }
 0x901   :  { %v1520_v49 = vmax.f32 %v1487_v45, 0.0  ;;  %v1490_v13 = vpop.f32.mrb[40].mxu1 }
 0x902   :  { %v1873_v23 = vpack.c.bf16 %v1519_v27, %v1517_v46  ;;  %v1492_v55 = vpop.f32.mrb[41].mxu1  ;;  %v1491_v5 = vadd.f32 %v1490_v13, %v1359_v38 }
 0x903   :  { %v1871_v39 = vpack.c.bf16 %v1520_v49, %v1518_v58  ;;  %v1493_v4 = vadd.f32 %v1492_v55, %v1359_v38 }
 0x904   :  { %v1521_v44 = vmax.f32 %v1491_v5, 0.0 }
 0x905   :  { %v1496_v0 = vpop.f32.mrb[42].mxu1  ;;  %1872 = vmatprep.subr.bf16.mxu0 %v1871_v39  ;;  %v1522_v33 = vmax.f32 %v1493_v4, 0.0 }
 0x906   :  { %v1497_v8 = vadd.f32 %v1496_v0, %v1364_v12  ;;  %v1498_v56 = vpop.f32.mrb[43].mxu1  ;;  %1874 = vmatpush1.bf16.msra.mxu0 %v1873_v23 }
 0x907   :  { %v1499_v42 = vadd.f32 %v1498_v56, %v1364_v12 }
 0x908   :  { %v1523_v34 = vmax.f32 %v1497_v8, 0.0 }
 0x909   :  { %v1524_v48 = vmax.f32 %v1499_v42, 0.0  ;;  %v1502_v63 = vpop.f32.mrb[44].mxu1 }
 0x90a   :  { %v1877_v18 = vpack.c.bf16 %v1523_v34, %v1521_v44  ;;  %v1504_v1 = vpop.f32.mrb[45].mxu1  ;;  %v1503_v20 = vadd.f32 %v1502_v63, %v1369_v57 }
 0x90b   :  { %v1875_v21 = vpack.c.bf16 %v1524_v48, %v1522_v33  ;;  %v1505_v15 = vadd.f32 %v1504_v1, %v1369_v57 }
 0x90c   :  { %v1525_v47 = vmax.f32 %v1503_v20, 0.0 }
 0x90d   :  { %v1508_v9 = vpop.f32.mrb[46].mxu1  ;;  %1876 = vmatprep.subr.bf16.mxu0 %v1875_v21  ;;  %v1526_v17 = vmax.f32 %v1505_v15, 0.0 }
 0x90e   :  { %v1509_v51 = vadd.f32 %v1508_v9, %v1374_v14  ;;  %v1510_v52 = vpop.f32.mrb[47].mxu1  ;;  %1878 = vmatpush1.bf16.msra.mxu0 %v1877_v18 }
 0x90f   :  { %v1511_v43 = vadd.f32 %v1510_v52, %v1374_v14 }
 0x910   :  { %v1527_v2 = vmax.f32 %v1509_v51, 0.0 }
 0x911   :  { %v1528_v19 = vmax.f32 %v1511_v43, 0.0 }
 0x912   :  { %v1882_v10 = vpack.c.bf16 %v1527_v2, %v1525_v47 }
 0x913   :  { %v1879_v24 = vpack.c.bf16 %v1528_v19, %v1526_v17 }
 0x915   :  { %1881 = vmatprep.subr.msk.bf16.mxu0 %vm2263_vm14, %v1879_v24 }
 0x916   :  { %1884 = vmatpush1.bf16.msk.msra.mxu0 %vm2263_vm14, %v1882_v10 }
 0x919   :  { %1749 = vmatmul.mubr.msk.f32.vlgmr.msra.gmra.mrb[22].mxu0 %vm513_vm15, %v2274_v30 }
 0x91a   :  { %1605 = vmatprep.mubr.f32.mxu0 %v1901_v3 }
 0x91d   :  { %1750 = vmatmul.mubr.msk.f32.gmra.mrb[24].mxu0 %vm513_vm15, %v2282_v31 }
 0x91e   :  { %1611 = vmatprep.mubr.f32.mxu0 %v1901_v3 }
 0x921   :  { %1751 = vmatmul.mubr.msk.f32.gmra.mrb[26].mxu0 %vm513_vm15, %v2290_v32 }
 0x922   :  { %1617 = vmatprep.mubr.f32.mxu0 %v1901_v3 }
 0x925   :  { %1752 = vmatmul.mubr.msk.f32.gmra.mrb[28].mxu0 %vm513_vm15, %v2298_v35 }
 0x9ec   :  { %v1601_v28 = vpop.f32.mrb[22].mxu0 }
 0x9ed   :  { %v1624_v25 = vmul.f32 0.3, %v1601_v28  ;;  %v1603_v26 = vpop.f32.mrb[23].mxu0 }
 0x9ee   :  { %v1625_v29 = vmul.f32 0.3, %v1603_v26 }
 0x9ef   :  { %v1632_v30 = vsub.f32 %v2520_v7, %v1624_v25 }
 0x9f0   :  { %v1633_v36 = vsub.f32 %v2514_v61, %v1625_v29  ;;  %v1607_v37 = vpop.f32.mrb[24].mxu0 }
 0x9f1   :  { %v1640_v31 = vmax.f32 %v1632_v30, 0.0  ;;  %v1626_v16 = vmul.f32 0.3, %v1607_v37  ;;  %v1609_v53 = vpop.f32.mrb[25].mxu0 }
 0x9f2   :  { %v1641_v54 = vmax.f32 %v1633_v36, 0.0  ;;  %v1627_v50 = vmul.f32 0.3, %v1609_v53 }
 0x9f3   :  { %v1648_v32 = vmin.f32 %v1640_v31, 1.0  ;;  %v1634_v3 = vsub.f32 %v2511_v60, %v1626_v16 }
 0x9f4   :  { %v1649_v40 = vmin.f32 %v1641_v54, 1.0  ;;  %v1635_v35 = vsub.f32 %v2517_v62, %v1627_v50  ;;  %v1613_v41 = vpop.f32.mrb[26].mxu0 }
 0x9f5   :  { %1656 = vst [vmem:[%s2760_s7] sm:$0xff] %v1648_v32  ;;  %v1642_v7 = vmax.f32 %v1634_v3, 0.0  ;;  %v1628_v45 = vmul.f32 0.3, %v1613_v41  ;;  %v1615_v61 = vpop.f32.mrb[27].mxu0 }
 0x9f6   :  { %1657 = vst [vmem:[%s2760_s7 + $0x8] sm:$0xff] %v1649_v40  ;;  %v1643_v46 = vmax.f32 %v1635_v35, 0.0  ;;  %v1629_v27 = vmul.f32 0.3, %v1615_v61 }
 0x9f7   :  { %v1650_v58 = vmin.f32 %v1642_v7, 1.0  ;;  %v1636_v60 = vsub.f32 %v2536_v11, %v1628_v45 }
 0x9f8   :  { %v1651_v49 = vmin.f32 %v1643_v46, 1.0  ;;  %v1637_v62 = vsub.f32 %v2530_v59, %v1629_v27  ;;  %v1619_v13 = vpop.f32.mrb[28].mxu0 }
 0x9f9   :  { %1658 = vst [vmem:[%s2760_s7 + $0x10] sm:$0xff] %v1650_v58  ;;  %v1644_v23 = vmax.f32 %v1636_v60, 0.0  ;;  %v1630_v55 = vmul.f32 0.3, %v1619_v13  ;;  %v1621_v38 = vpop.f32.mrb[29].mxu0 }
 0x9fa   :  { %1659 = vst [vmem:[%s2760_s7 + $0x18] sm:$0xff] %v1651_v49  ;;  %v1645_v39 = vmax.f32 %v1637_v62, 0.0  ;;  %v1631_v5 = vmul.f32 0.3, %v1621_v38 }
 0x9fb   :  { %v1652_v12 = vmin.f32 %v1644_v23, 1.0  ;;  %v1638_v11 = vsub.f32 %v2527_v22, %v1630_v55 }
 0x9fc   :  { %v1653_v4 = vmin.f32 %v1645_v39, 1.0  ;;  %v1639_v59 = vsub.f32 %v2533_v6, %v1631_v5 }
 0x9fd   :  { %1660 = vst [vmem:[%s2760_s7 + $0x20] sm:$0xff] %v1652_v12  ;;  %v1646_v0 = vmax.f32 %v1638_v11, 0.0 }
 0x9fe   :  { %1661 = vst [vmem:[%s2760_s7 + $0x28] sm:$0xff] %v1653_v4  ;;  %v1647_v8 = vmax.f32 %v1639_v59, 0.0 }
 0x9ff   :  { %v1654_v56 = vmin.f32 %v1646_v0, 1.0 }
 0xa00   :  { %v1655_v42 = vmin.f32 %v1647_v8, 1.0 }
 0xa01   :  { %1662 = vst [vmem:[%s2760_s7 + $0x30] sm:$0x7f] %v1654_v56 }
 0xa02   :  { %1663 = vst [vmem:[%s2760_s7 + $0x38] sm:$0x7f] %v1655_v42 }

</bundles_post_ra>
